<compile_context>
chip_gen: v6e
topology: v6e:2x2x1
jax: 0.10.0
libtpu: 0.0.40
codegen_flags: <defaults>
</compile_context>

<pallas_src>
import jax
import jax.numpy as jnp
from jax.experimental import pallas as pl
from jax.experimental.pallas import tpu as pltpu

K = 5                          # conv kernel size (all three convs)
H_IN = 32                      # LeNet input spatial size (32x32x3)
C_IN = 3
C1, C2, C3 = 6, 16, 120        # conv output channels
F1, F2 = 84, 10                # FC sizes
HP1 = (H_IN - K + 1) // 2      # 14: pooled size after stage 1
HP2 = (HP1 - K + 1) // 2       # 5:  pooled size after stage 2
BP = 8                         # images per call (batch padded to an 8-row block)
HALF = 128                     # lane half width (intermediates padded to 128 lanes)
NPAD = 128                     # padded head / logits width (unmasked store)
L1K = K * H_IN * C_IN          # 480: stage-1 contraction (5 input rows x 96 lanes)
L1KP = 512                     # ... padded to a multiple of 128
R1 = HP1 * BP                  # 112: stage-1 output rows per pool-row phase
R2 = 2 * HP2 * BP              # 80:  stage-2 output rows (j = 2*v2 + a2, batch-minor)


def _vmem_specs(n):
    return [pl.BlockSpec(memory_space=pltpu.MemorySpace.VMEM) for _ in range(n)]


def lenet_fused_kernel(l1_ref, m1_ref, bias1_ref, m2_ref, bias2_ref,
                       w3_ref, b3_ref, w4_ref, b4_ref, w5_ref, b5_ref, o_ref):
    """Whole LeNet forward for up to BP images: 9 MXU matmuls, no grid.

    l1_ref  : (2*R1, L1KP)     im2row'd input; row a*R1 + h1*BP + bb,
                               lane kh*96 + w*3 + c = x[bb, 2*h1 + a + kh, w, c].
    m1_ref  : (L1KP, 2*HALF)   stage-1 banded weights; output halves = pool-col phase b.
    m2_ref  : (K, HALF, 2*HALF) stage-2 banded weights; slab kh = kernel row.
    bias*   : (1, 2*HALF)      conv biases tiled over pooled cols (both halves).
    w3..b5  : head weights, all padded to 128 lanes.
    o_ref   : (BP, NPAD)       padded logits.
    """
    # ---- stage 1: conv1(5x5, 3->6) + tanh + maxpool 2x2 — ONE matmul -------------
    z1 = jnp.tanh(jnp.dot(l1_ref[...], m1_ref[...],
                          preferred_element_type=jnp.float32) + bias1_ref[...])
    zb1 = jnp.maximum(z1[:, :HALF], z1[:, HALF:])        # max over pool-col phase b
    p1 = jnp.maximum(zb1[:R1], zb1[R1:])                 # max over pool-row phase a
    # p1: (112, 128), row h1*8 + bb, lane v*6 + co  == pooled1[bb, h1, v, co]

    # ---- stage 2: conv2(5x5, 6->16) + tanh + maxpool 2x2 — 5 matmuls -------------
    # LHS for kernel row kh is p1 shifted by kh*8 rows (8-aligned); output row
    # j*8 + bb corresponds to conv row j = 2*v2 + a2 of image bb.
    acc2 = jnp.dot(p1[:R2], m2_ref[0], preferred_element_type=jnp.float32)
    for kh in range(1, K):
        acc2 = acc2 + jnp.dot(p1[kh * BP:kh * BP + R2], m2_ref[kh],
                              preferred_element_type=jnp.float32)
    z2 = jnp.tanh(acc2 + bias2_ref[...])                 # (80, 256)
    zb2 = jnp.maximum(z2[:, :HALF], z2[:, HALF:])        # max over pool-col phase b2
    # max over pool-row phase a2 = max of adjacent 8-row blocks; assemble the five
    # pooled rows as aligned 128-lane blocks so conv3 is a single 640-lane contraction.
    p2 = jnp.concatenate(
        [jnp.maximum(zb2[2 * v2 * BP:(2 * v2 + 1) * BP],
                     zb2[(2 * v2 + 1) * BP:(2 * v2 + 2) * BP]) for v2 in range(HP2)],
        axis=1)                                          # (8, 640), row = bb

    # ---- head: conv3(5x5, 16->120) == matmul, dropout, FC-tanh-FC ----------------
    # TODO(synk): nn.Dropout(p=0.5) treated as identity (eval-mode semantics).
    h3 = jnp.dot(p2, w3_ref[...], preferred_element_type=jnp.float32) + b3_ref[...]
    h4 = jnp.tanh(jnp.dot(h3, w4_ref[...], preferred_element_type=jnp.float32)
                  + b4_ref[...])
    o_ref[...] = (jnp.dot(h4, w5_ref[...], preferred_element_type=jnp.float32)
                  + b5_ref[...])                         # one unmasked (8, 128) store


def init_raw_params(key):
    """PyTorch-style uniform(-1/sqrt(fan_in), 1/sqrt(fan_in)) init.
    Conv weights in (KH, KW, Cin, Cout), linear weights in (in, out)."""
    def uconv(k, kh, kw, cin, cout):
        kw_, kb_ = jax.random.split(k)
        bound = 1.0 / float(cin * kh * kw) ** 0.5
        w = jax.random.uniform(kw_, (kh, kw, cin, cout), jnp.float32, -bound, bound)
        b = jax.random.uniform(kb_, (1, cout), jnp.float32, -bound, bound)
        return w, b

    def ulin(k, fin, fout):
        kw_, kb_ = jax.random.split(k)
        bound = 1.0 / float(fin) ** 0.5
        w = jax.random.uniform(kw_, (fin, fout), jnp.float32, -bound, bound)
        b = jax.random.uniform(kb_, (1, fout), jnp.float32, -bound, bound)
        return w, b

    k1, k2, k3, k4, k5 = jax.random.split(key, 5)
    w1, b1 = uconv(k1, K, K, C_IN, C1)     # Conv2d(3, 6, 5)
    w2, b2 = uconv(k2, K, K, C1, C2)       # Conv2d(6, 16, 5)
    w3, b3 = uconv(k3, K, K, C2, C3)       # Conv2d(16, 120, 5) -> 1x1 output == matmul
    w4, b4 = ulin(k4, C3, F1)              # Linear(120, 84)
    w5, b5 = ulin(k5, F1, F2)              # Linear(84, 10)
    return dict(w1=w1, b1=b1, w2=w2, b2=b2, w3=w3, b3=b3, w4=w4, b4=b4, w5=w5, b5=b5)


def _band_matrix(w, w_in, wp):
    """Banded weights for a conv+pool stage: (2, K, w_in*cin, wp*cout).

    Slab [b, kh] maps one input row (lane = w*cin + c) to one pooled-output row for
    pool-col phase b and kernel row kh:
        out[v*cout + co] = sum_{kw, c} w[kh, kw, c, co] * in[(2v + b + kw)*cin + c].
    """
    kk, _, cin, cout = w.shape
    win = jnp.arange(w_in)[:, None, None]
    v = jnp.arange(wp)[None, :, None]
    kw = jnp.arange(kk)[None, None, :]
    out = []
    for b in range(2):
        sel = (win == 2 * v + b + kw).astype(w.dtype)            # (w_in, wp, K)
        m = jnp.einsum("wvq,kqco->kwcvo", sel, w)                # (K, w_in, cin, wp, cout)
        out.append(m.reshape(kk, w_in * cin, wp * cout))
    return jnp.stack(out)                                        # (2, K, ...)


def _pack_stage1(w1):
    """(512, 256): rows kh*96 + w*3 + c (zero-padded 480->512), cols b*128 + v*6 + co."""
    band = _band_matrix(w1, H_IN, HP1)                           # (2, 5, 96, 84)
    band = jnp.pad(band, ((0, 0), (0, 0), (0, 0), (0, HALF - HP1 * C1)))
    m = jnp.transpose(band, (1, 2, 0, 3)).reshape(L1K, 2 * HALF)
    return jnp.pad(m, ((0, L1KP - L1K), (0, 0)))


def _pack_stage2(w2):
    """(5, 128, 256): slab kh, rows v*6 + c (84 valid), cols b2*128 + v2c*16 + co."""
    band = _band_matrix(w2, HP1, HP2)                            # (2, 5, 84, 80)
    band = jnp.pad(band, ((0, 0), (0, 0), (0, HALF - HP1 * C1), (0, HALF - HP2 * C2)))
    return jnp.transpose(band, (1, 2, 0, 3)).reshape(K, HALF, 2 * HALF)


def _tile_pool_bias(b, wp):
    """Conv bias tiled over pooled columns, padded to 128 lanes, both pool-col halves."""
    half = jnp.pad(jnp.tile(b, (1, wp)), ((0, 0), (0, HALF - wp * b.shape[1])))
    return jnp.concatenate([half, half], axis=1)                 # (1, 256)


def build_kernel_params(raw):
    """One-time repack of raw weights into the kernel-ready (MXU/banded, 128-lane) layout."""
    w3 = jnp.pad(raw["w3"].reshape(K, K * C2, C3),
                 ((0, 0), (0, HALF - K * C2), (0, NPAD - C3))).reshape(K * HALF, NPAD)
    return dict(
        m1=_pack_stage1(raw["w1"]),                              # (512, 256)
        m2=_pack_stage2(raw["w2"]),                              # (5, 128, 256)
        bias1=_tile_pool_bias(raw["b1"], HP1),                   # (1, 256)
        bias2=_tile_pool_bias(raw["b2"], HP2),                   # (1, 256)
        w3=w3,                                                   # (640, 128)
        b3=jnp.pad(raw["b3"], ((0, 0), (0, NPAD - C3))),
        w4=jnp.pad(raw["w4"], ((0, NPAD - C3), (0, NPAD - F1))),
        b4=jnp.pad(raw["b4"], ((0, 0), (0, NPAD - F1))),
        w5=jnp.pad(raw["w5"], ((0, NPAD - F1), (0, NPAD - F2))),
        b5=jnp.pad(raw["b5"], ((0, 0), (0, NPAD - F2))),
    )


def _build_stage1_lhs(x_nhwc):
    """Im2row'd, phase/batch-stacked stage-1 LHS: (2*R1, 512).

    Row a*112 + h1*8 + bb holds, at lane kh*96 + w*3 + c, the pixel
    x[bb, 2*h1 + a + kh, w, c]; zero in the padded batch rows / padded lanes.
    Pure gather/pad — layout plumbing, no arithmetic hoisted out of the kernel.
    """
    b = x_nhwc.shape[0]
    xr = x_nhwc.reshape(b, H_IN, H_IN * C_IN)                    # (B, 32, 96)
    rows = (2 * jnp.arange(HP1)[None, :, None]                   # h1
            + jnp.arange(2)[:, None, None]                       # a  (pool-row phase)
            + jnp.arange(K)[None, None, :])                      # kh -> (2, 14, 5)
    g = xr[:, rows, :]                                           # (B, 2, 14, 5, 96)
    g = jnp.transpose(g, (1, 2, 0, 3, 4)).reshape(2, HP1, b, L1K)
    g = jnp.pad(g, ((0, 0), (0, 0), (0, BP - b), (0, L1KP - L1K)))
    return g.reshape(2 * R1, L1KP)                               # (224, 512)


@jax.jit
def neural_net_forward(kparams, x_nchw):
    # Note: the plt.imshow/plt.show calls in the reference forward are
    # visualization-only side effects and are skipped.
    batch = x_nchw.shape[0]
    if batch > BP:
        raise ValueError("add a ('parallel',) grid over 8-image blocks for batch > 8")
    x_nhwc = jnp.transpose(x_nchw, (0, 2, 3, 1))
    l1 = _build_stage1_lhs(x_nhwc)
    padded = pl.pallas_call(
        lenet_fused_kernel,
        out_shape=jax.ShapeDtypeStruct((BP, NPAD), jnp.float32),
        in_specs=_vmem_specs(11),
        out_specs=pl.BlockSpec(memory_space=pltpu.MemorySpace.VMEM),
    )(l1, kparams["m1"], kparams["bias1"], kparams["m2"], kparams["bias2"],
      kparams["w3"], kparams["b3"], kparams["w4"], kparams["b4"],
      kparams["w5"], kparams["b5"])
    return padded[:batch, :F2]


def reference_forward(raw, x_nchw):
    """Pure-JAX (non-Pallas) reference with identical semantics, for validation."""
    def conv(x, w, b):
        y = jax.lax.conv_general_dilated(x, w, (1, 1), "VALID",
                                         dimension_numbers=("NHWC", "HWIO", "NHWC"))
        return y + b.reshape(1, 1, 1, -1)

    def pool(x):
        return jax.lax.reduce_window(x, -jnp.inf, jax.lax.max,
                                     (1, 2, 2, 1), (1, 2, 2, 1), "VALID")

    x = jnp.transpose(x_nchw, (0, 2, 3, 1))
    x = pool(jnp.tanh(conv(x, raw["w1"], raw["b1"])))
    x = pool(jnp.tanh(conv(x, raw["w2"], raw["b2"])))
    x = conv(x, raw["w3"], raw["b3"]).reshape(x.shape[0], -1)    # (B, 120); dropout = id
    x = jnp.tanh(x @ raw["w4"] + raw["b4"])
    return x @ raw["w5"] + raw["b5"]


if __name__ == "__main__":
    key = jax.random.PRNGKey(0)
    k_x, k_p = jax.random.split(key)
    # LeNet-style architecture implies 32x32x3 input (PyTorch NCHW).
    x = jax.random.normal(k_x, (2, C_IN, H_IN, H_IN), dtype=jnp.float32)
    raw = init_raw_params(k_p)
    kparams = build_kernel_params(raw)

    out = neural_net_forward(kparams, x)
    out = jax.block_until_ready(out)
    assert out.shape == (2, F2) and out.dtype == jnp.float32

    ref = reference_forward(raw, x)
    err = float(jnp.max(jnp.abs(out - ref)))
    assert jnp.allclose(out, ref, atol=5e-4, rtol=5e-4), err
    print("KERNEL_OK")
</pallas_src>

<mosaic_0001>
module attributes {stable_mosaic.version = 11 : i64} {
  func.func @lenet_fused_kernel(%arg0: memref<224x512xf32, #tpu.memory_space<vmem>>, %arg1: memref<512x256xf32, #tpu.memory_space<vmem>>, %arg2: memref<1x256xf32, #tpu.memory_space<vmem>>, %arg3: memref<5x128x256xf32, #tpu.memory_space<vmem>>, %arg4: memref<1x256xf32, #tpu.memory_space<vmem>>, %arg5: memref<640x128xf32, #tpu.memory_space<vmem>>, %arg6: memref<1x128xf32, #tpu.memory_space<vmem>>, %arg7: memref<128x128xf32, #tpu.memory_space<vmem>>, %arg8: memref<1x128xf32, #tpu.memory_space<vmem>>, %arg9: memref<128x128xf32, #tpu.memory_space<vmem>>, %arg10: memref<1x128xf32, #tpu.memory_space<vmem>>, %arg11: memref<8x128xf32, #tpu.memory_space<vmem>>) attributes {dimension_semantics = [], scalar_prefetch = 0 : i64, scratch_operands = 0 : i64, tpu.core_type = #tpu.core_type<tc>} {
    %c0 = arith.constant 0 : index
    %c0_0 = arith.constant 0 : index
    %0 = vector.load %arg0[%c0, %c0_0] : memref<224x512xf32, #tpu.memory_space<vmem>>, vector<224x512xf32>
    %c0_1 = arith.constant 0 : index
    %c0_2 = arith.constant 0 : index
    %1 = vector.load %arg1[%c0_1, %c0_2] : memref<512x256xf32, #tpu.memory_space<vmem>>, vector<512x256xf32>
    %cst = arith.constant dense<0.000000e+00> : vector<224x256xf32>
    %2 = tpu.matmul %0, %1, %cst {dimension_numbers = #tpu.dot_dimension_numbers<[1], [0], [0], [1], [0, 0, 1, 1], [], []>} : vector<224x512xf32>, vector<512x256xf32>, vector<224x256xf32> -> vector<224x256xf32>
    %c0_3 = arith.constant 0 : index
    %c0_4 = arith.constant 0 : index
    %3 = vector.load %arg2[%c0_3, %c0_4] : memref<1x256xf32, #tpu.memory_space<vmem>>, vector<1x256xf32>
    %4 = vector.broadcast %3 : vector<1x256xf32> to vector<224x256xf32>
    %5 = arith.addf %2, %4 : vector<224x256xf32>
    %6 = math.tanh %5 : vector<224x256xf32>
    %7 = vector.extract_strided_slice %6 {offsets = [0, 0], sizes = [224, 128], strides = [1, 1]} : vector<224x256xf32> to vector<224x128xf32>
    %8 = vector.extract_strided_slice %6 {offsets = [0, 128], sizes = [224, 128], strides = [1, 1]} : vector<224x256xf32> to vector<224x128xf32>
    %9 = arith.maximumf %7, %8 : vector<224x128xf32>
    %10 = vector.extract_strided_slice %9 {offsets = [0, 0], sizes = [112, 128], strides = [1, 1]} : vector<224x128xf32> to vector<112x128xf32>
    %11 = vector.extract_strided_slice %9 {offsets = [112, 0], sizes = [112, 128], strides = [1, 1]} : vector<224x128xf32> to vector<112x128xf32>
    %12 = arith.maximumf %10, %11 : vector<112x128xf32>
    %13 = vector.extract_strided_slice %12 {offsets = [0, 0], sizes = [80, 128], strides = [1, 1]} : vector<112x128xf32> to vector<80x128xf32>
    %c0_5 = arith.constant 0 : index
    %c0_6 = arith.constant 0 : index
    %c0_7 = arith.constant 0 : index
    %14 = vector.load %arg3[%c0_5, %c0_6, %c0_7] : memref<5x128x256xf32, #tpu.memory_space<vmem>>, vector<1x128x256xf32>
    %15 = vector.shape_cast %14 : vector<1x128x256xf32> to vector<128x256xf32>
    %cst_8 = arith.constant dense<0.000000e+00> : vector<80x256xf32>
    %16 = tpu.matmul %13, %15, %cst_8 {dimension_numbers = #tpu.dot_dimension_numbers<[1], [0], [0], [1], [0, 0, 1, 1], [], []>} : vector<80x128xf32>, vector<128x256xf32>, vector<80x256xf32> -> vector<80x256xf32>
    %17 = vector.extract_strided_slice %12 {offsets = [8, 0], sizes = [80, 128], strides = [1, 1]} : vector<112x128xf32> to vector<80x128xf32>
    %c1 = arith.constant 1 : index
    %c0_9 = arith.constant 0 : index
    %c0_10 = arith.constant 0 : index
    %18 = vector.load %arg3[%c1, %c0_9, %c0_10] : memref<5x128x256xf32, #tpu.memory_space<vmem>>, vector<1x128x256xf32>
    %19 = vector.shape_cast %18 : vector<1x128x256xf32> to vector<128x256xf32>
    %cst_11 = arith.constant dense<0.000000e+00> : vector<80x256xf32>
    %20 = tpu.matmul %17, %19, %cst_11 {dimension_numbers = #tpu.dot_dimension_numbers<[1], [0], [0], [1], [0, 0, 1, 1], [], []>} : vector<80x128xf32>, vector<128x256xf32>, vector<80x256xf32> -> vector<80x256xf32>
    %21 = arith.addf %16, %20 : vector<80x256xf32>
    %22 = vector.extract_strided_slice %12 {offsets = [16, 0], sizes = [80, 128], strides = [1, 1]} : vector<112x128xf32> to vector<80x128xf32>
    %c2 = arith.constant 2 : index
    %c0_12 = arith.constant 0 : index
    %c0_13 = arith.constant 0 : index
    %23 = vector.load %arg3[%c2, %c0_12, %c0_13] : memref<5x128x256xf32, #tpu.memory_space<vmem>>, vector<1x128x256xf32>
    %24 = vector.shape_cast %23 : vector<1x128x256xf32> to vector<128x256xf32>
    %cst_14 = arith.constant dense<0.000000e+00> : vector<80x256xf32>
    %25 = tpu.matmul %22, %24, %cst_14 {dimension_numbers = #tpu.dot_dimension_numbers<[1], [0], [0], [1], [0, 0, 1, 1], [], []>} : vector<80x128xf32>, vector<128x256xf32>, vector<80x256xf32> -> vector<80x256xf32>
    %26 = arith.addf %21, %25 : vector<80x256xf32>
    %27 = vector.extract_strided_slice %12 {offsets = [24, 0], sizes = [80, 128], strides = [1, 1]} : vector<112x128xf32> to vector<80x128xf32>
    %c3 = arith.constant 3 : index
    %c0_15 = arith.constant 0 : index
    %c0_16 = arith.constant 0 : index
    %28 = vector.load %arg3[%c3, %c0_15, %c0_16] : memref<5x128x256xf32, #tpu.memory_space<vmem>>, vector<1x128x256xf32>
    %29 = vector.shape_cast %28 : vector<1x128x256xf32> to vector<128x256xf32>
    %cst_17 = arith.constant dense<0.000000e+00> : vector<80x256xf32>
    %30 = tpu.matmul %27, %29, %cst_17 {dimension_numbers = #tpu.dot_dimension_numbers<[1], [0], [0], [1], [0, 0, 1, 1], [], []>} : vector<80x128xf32>, vector<128x256xf32>, vector<80x256xf32> -> vector<80x256xf32>
    %31 = arith.addf %26, %30 : vector<80x256xf32>
    %32 = vector.extract_strided_slice %12 {offsets = [32, 0], sizes = [80, 128], strides = [1, 1]} : vector<112x128xf32> to vector<80x128xf32>
    %c4 = arith.constant 4 : index
    %c0_18 = arith.constant 0 : index
    %c0_19 = arith.constant 0 : index
    %33 = vector.load %arg3[%c4, %c0_18, %c0_19] : memref<5x128x256xf32, #tpu.memory_space<vmem>>, vector<1x128x256xf32>
    %34 = vector.shape_cast %33 : vector<1x128x256xf32> to vector<128x256xf32>
    %cst_20 = arith.constant dense<0.000000e+00> : vector<80x256xf32>
    %35 = tpu.matmul %32, %34, %cst_20 {dimension_numbers = #tpu.dot_dimension_numbers<[1], [0], [0], [1], [0, 0, 1, 1], [], []>} : vector<80x128xf32>, vector<128x256xf32>, vector<80x256xf32> -> vector<80x256xf32>
    %36 = arith.addf %31, %35 : vector<80x256xf32>
    %c0_21 = arith.constant 0 : index
    %c0_22 = arith.constant 0 : index
    %37 = vector.load %arg4[%c0_21, %c0_22] : memref<1x256xf32, #tpu.memory_space<vmem>>, vector<1x256xf32>
    %38 = vector.broadcast %37 : vector<1x256xf32> to vector<80x256xf32>
    %39 = arith.addf %36, %38 : vector<80x256xf32>
    %40 = math.tanh %39 : vector<80x256xf32>
    %41 = vector.extract_strided_slice %40 {offsets = [0, 0], sizes = [80, 128], strides = [1, 1]} : vector<80x256xf32> to vector<80x128xf32>
    %42 = vector.extract_strided_slice %40 {offsets = [0, 128], sizes = [80, 128], strides = [1, 1]} : vector<80x256xf32> to vector<80x128xf32>
    %43 = arith.maximumf %41, %42 : vector<80x128xf32>
    %44 = vector.extract_strided_slice %43 {offsets = [0, 0], sizes = [8, 128], strides = [1, 1]} : vector<80x128xf32> to vector<8x128xf32>
    %45 = vector.extract_strided_slice %43 {offsets = [8, 0], sizes = [8, 128], strides = [1, 1]} : vector<80x128xf32> to vector<8x128xf32>
    %46 = arith.maximumf %44, %45 : vector<8x128xf32>
    %47 = vector.extract_strided_slice %43 {offsets = [16, 0], sizes = [8, 128], strides = [1, 1]} : vector<80x128xf32> to vector<8x128xf32>
    %48 = vector.extract_strided_slice %43 {offsets = [24, 0], sizes = [8, 128], strides = [1, 1]} : vector<80x128xf32> to vector<8x128xf32>
    %49 = arith.maximumf %47, %48 : vector<8x128xf32>
    %50 = vector.extract_strided_slice %43 {offsets = [32, 0], sizes = [8, 128], strides = [1, 1]} : vector<80x128xf32> to vector<8x128xf32>
    %51 = vector.extract_strided_slice %43 {offsets = [40, 0], sizes = [8, 128], strides = [1, 1]} : vector<80x128xf32> to vector<8x128xf32>
    %52 = arith.maximumf %50, %51 : vector<8x128xf32>
    %53 = vector.extract_strided_slice %43 {offsets = [48, 0], sizes = [8, 128], strides = [1, 1]} : vector<80x128xf32> to vector<8x128xf32>
    %54 = vector.extract_strided_slice %43 {offsets = [56, 0], sizes = [8, 128], strides = [1, 1]} : vector<80x128xf32> to vector<8x128xf32>
    %55 = arith.maximumf %53, %54 : vector<8x128xf32>
    %56 = vector.extract_strided_slice %43 {offsets = [64, 0], sizes = [8, 128], strides = [1, 1]} : vector<80x128xf32> to vector<8x128xf32>
    %57 = vector.extract_strided_slice %43 {offsets = [72, 0], sizes = [8, 128], strides = [1, 1]} : vector<80x128xf32> to vector<8x128xf32>
    %58 = arith.maximumf %56, %57 : vector<8x128xf32>
    %59 = tpu.concatenate %46, %49, %52, %55, %58 in 1 : vector<8x128xf32>, vector<8x128xf32>, vector<8x128xf32>, vector<8x128xf32>, vector<8x128xf32> -> vector<8x640xf32>
    %c0_23 = arith.constant 0 : index
    %c0_24 = arith.constant 0 : index
    %60 = vector.load %arg5[%c0_23, %c0_24] : memref<640x128xf32, #tpu.memory_space<vmem>>, vector<640x128xf32>
    %cst_25 = arith.constant dense<0.000000e+00> : vector<8x128xf32>
    %61 = tpu.matmul %59, %60, %cst_25 {dimension_numbers = #tpu.dot_dimension_numbers<[1], [0], [0], [1], [0, 0, 1, 1], [], []>} : vector<8x640xf32>, vector<640x128xf32>, vector<8x128xf32> -> vector<8x128xf32>
    %c0_26 = arith.constant 0 : index
    %c0_27 = arith.constant 0 : index
    %62 = vector.load %arg6[%c0_26, %c0_27] : memref<1x128xf32, #tpu.memory_space<vmem>>, vector<1x128xf32>
    %63 = vector.broadcast %62 : vector<1x128xf32> to vector<8x128xf32>
    %64 = arith.addf %61, %63 : vector<8x128xf32>
    %c0_28 = arith.constant 0 : index
    %c0_29 = arith.constant 0 : index
    %65 = vector.load %arg7[%c0_28, %c0_29] : memref<128x128xf32, #tpu.memory_space<vmem>>, vector<128x128xf32>
    %cst_30 = arith.constant dense<0.000000e+00> : vector<8x128xf32>
    %66 = tpu.matmul %64, %65, %cst_30 {dimension_numbers = #tpu.dot_dimension_numbers<[1], [0], [0], [1], [0, 0, 1, 1], [], []>} : vector<8x128xf32>, vector<128x128xf32>, vector<8x128xf32> -> vector<8x128xf32>
    %c0_31 = arith.constant 0 : index
    %c0_32 = arith.constant 0 : index
    %67 = vector.load %arg8[%c0_31, %c0_32] : memref<1x128xf32, #tpu.memory_space<vmem>>, vector<1x128xf32>
    %68 = vector.broadcast %67 : vector<1x128xf32> to vector<8x128xf32>
    %69 = arith.addf %66, %68 : vector<8x128xf32>
    %70 = math.tanh %69 : vector<8x128xf32>
    %c0_33 = arith.constant 0 : index
    %c0_34 = arith.constant 0 : index
    %71 = vector.load %arg9[%c0_33, %c0_34] : memref<128x128xf32, #tpu.memory_space<vmem>>, vector<128x128xf32>
    %cst_35 = arith.constant dense<0.000000e+00> : vector<8x128xf32>
    %72 = tpu.matmul %70, %71, %cst_35 {dimension_numbers = #tpu.dot_dimension_numbers<[1], [0], [0], [1], [0, 0, 1, 1], [], []>} : vector<8x128xf32>, vector<128x128xf32>, vector<8x128xf32> -> vector<8x128xf32>
    %c0_36 = arith.constant 0 : index
    %c0_37 = arith.constant 0 : index
    %73 = vector.load %arg10[%c0_36, %c0_37] : memref<1x128xf32, #tpu.memory_space<vmem>>, vector<1x128xf32>
    %74 = vector.broadcast %73 : vector<1x128xf32> to vector<8x128xf32>
    %75 = arith.addf %72, %74 : vector<8x128xf32>
    %c0_38 = arith.constant 0 : index
    %c0_39 = arith.constant 0 : index
    %76 = vector.load %arg11[%c0_38, %c0_39] : memref<8x128xf32, #tpu.memory_space<vmem>>, vector<8x128xf32>
    tpu.vector_store %arg11[%c0_38, %c0_39], %75 {strides = array<i32>} : memref<8x128xf32, #tpu.memory_space<vmem>>, vector<8x128xf32>,
    return
  }
}

</mosaic_0001>

<bundles_post_ra>
// kernel: neural_net_forward.1
= control target key start
LH: loop header
LB: loop body
LE: loop exit
PB: predicated region body
PF: predicated region fallthrough
CT: control target
= control target key end

     0   :  { %vm2773_vm0 = vmmov 0   ;;  %s4986_s1 = inlined_call_operand.vmem [shape: f32[512,256], index: 1, kind: input, shape index: {}]   ;;  %s4987_s0 = inlined_call_operand.vmem [shape: f32[224,512], index: 0, kind: input, shape index: {}]   ;;  %s4988_s3 = inlined_call_operand.vmem [shape: f32[5,128,256], index: 3, kind: input, shape index: {}]   ;;  %s4989_s2 = inlined_call_operand.vmem [shape: f32[1,256], index: 2, kind: input, shape index: {}]   ;;  %s4990_s5 = inlined_call_operand.vmem [shape: f32[640,128], index: 5, kind: input, shape index: {}]   ;;  %s4991_s4 = inlined_call_operand.vmem [shape: f32[1,256], index: 4, kind: input, shape index: {}]   ;;  %s4992_s7 = inlined_call_operand.vmem [shape: f32[128,128], index: 7, kind: input, shape index: {}]   ;;  %s4993_s9 = inlined_call_operand.vmem [shape: f32[128,128], index: 9, kind: input, shape index: {}]   ;;  %s4994_s6 = inlined_call_operand.vmem [shape: f32[1,128], index: 6, kind: input, shape index: {}]   ;;  %s4995_s8 = inlined_call_operand.vmem [shape: f32[1,128], index: 8, kind: input, shape index: {}]   ;;  %s4996_s10 = inlined_call_operand.vmem [shape: f32[1,128], index: 10, kind: input, shape index: {}]   ;;  %s4997_s11 = inlined_call_operand.vmem [shape: f32[8,128], index: 11, kind: output, shape index: {}]  }
   0x1   :  { %v181_v0 = vld [vmem:[%s4986_s1 + $0xf8] sm:$0xff]  ;;  %v180_v2 = vld [vmem:[%s4986_s1 + $0xf0] sm:$0xff]  ;;  %v179_v4 = vld [vmem:[%s4986_s1 + $0xe8] sm:$0xff] }
   0x2   :  { %v245_v1 = vld [vmem:[%s4986_s1 + $0x2f8] sm:$0xff]  ;;  %290 = vmatprep.subr.mxu0 %v181_v0  ;;  %v244_v3 = vld [vmem:[%s4986_s1 + $0x2f0] sm:$0xff]  ;;  %v243_v5 = vld [vmem:[%s4986_s1 + $0x2e8] sm:$0xff] }
   0x3   :  { %523 = vmatprep.subr.mxu1 %v245_v1  ;;  %291 = vmatpush1.msra.mxu0 %v180_v2  ;;  %v178_v6 = vld [vmem:[%s4986_s1 + $0xe0] sm:$0xff]  ;;  %v177_v8 = vld [vmem:[%s4986_s1 + $0xd8] sm:$0xff]  ;;  %v176_v10 = vld [vmem:[%s4986_s1 + $0xd0] sm:$0xff] }
   0x4   :  { %524 = vmatpush1.msra.mxu1 %v244_v3  ;;  %v242_v7 = vld [vmem:[%s4986_s1 + $0x2e0] sm:$0xff]  ;;  %292 = vmatprep.subr.mxu0 %v179_v4  ;;  %v241_v9 = vld [vmem:[%s4986_s1 + $0x2d8] sm:$0xff]  ;;  %v240_v11 = vld [vmem:[%s4986_s1 + $0x2d0] sm:$0xff] }
   0x5   :  { %525 = vmatprep.subr.mxu1 %v243_v5  ;;  %293 = vmatpush1.msra.mxu0 %v178_v6  ;;  %v175_v12 = vld [vmem:[%s4986_s1 + $0xc8] sm:$0xff]  ;;  %v174_v14 = vld [vmem:[%s4986_s1 + $0xc0] sm:$0xff]  ;;  %v173_v16 = vld [vmem:[%s4986_s1 + $0xb8] sm:$0xff] }
   0x6   :  { %526 = vmatpush1.msra.mxu1 %v242_v7  ;;  %v239_v13 = vld [vmem:[%s4986_s1 + $0x2c8] sm:$0xff]  ;;  %294 = vmatprep.subr.mxu0 %v177_v8  ;;  %v238_v15 = vld [vmem:[%s4986_s1 + $0x2c0] sm:$0xff]  ;;  %v237_v17 = vld [vmem:[%s4986_s1 + $0x2b8] sm:$0xff] }
   0x7   :  { %527 = vmatprep.subr.mxu1 %v241_v9  ;;  %295 = vmatpush1.msra.mxu0 %v176_v10  ;;  %v172_v18 = vld [vmem:[%s4986_s1 + $0xb0] sm:$0xff]  ;;  %v171_v20 = vld [vmem:[%s4986_s1 + $0xa8] sm:$0xff]  ;;  %v170_v22 = vld [vmem:[%s4986_s1 + $0xa0] sm:$0xff] }
   0x8   :  { %528 = vmatpush1.msra.mxu1 %v240_v11  ;;  %296 = vmatprep.subr.mxu0 %v175_v12  ;;  %v236_v19 = vld [vmem:[%s4986_s1 + $0x2b0] sm:$0xff]  ;;  %v235_v21 = vld [vmem:[%s4986_s1 + $0x2a8] sm:$0xff]  ;;  %v234_v23 = vld [vmem:[%s4986_s1 + $0x2a0] sm:$0xff] }
   0x9   :  { %529 = vmatprep.subr.mxu1 %v239_v13  ;;  %297 = vmatpush1.msra.mxu0 %v174_v14  ;;  %v169_v24 = vld [vmem:[%s4986_s1 + $0x98] sm:$0xff]  ;;  %v168_v26 = vld [vmem:[%s4986_s1 + $0x90] sm:$0xff]  ;;  %v167_v28 = vld [vmem:[%s4986_s1 + $0x88] sm:$0xff] }
   0xa   :  { %530 = vmatpush1.msra.mxu1 %v238_v15  ;;  %298 = vmatprep.subr.mxu0 %v173_v16  ;;  %v233_v25 = vld [vmem:[%s4986_s1 + $0x298] sm:$0xff]  ;;  %v232_v27 = vld [vmem:[%s4986_s1 + $0x290] sm:$0xff]  ;;  %v231_v29 = vld [vmem:[%s4986_s1 + $0x288] sm:$0xff] }
   0xb   :  { %531 = vmatprep.subr.mxu1 %v237_v17  ;;  %299 = vmatpush1.msra.mxu0 %v172_v18  ;;  %v166_v30 = vld [vmem:[%s4986_s1 + $0x80] sm:$0xff]  ;;  %v165_v32 = vld [vmem:[%s4986_s1 + $0x78] sm:$0xff]  ;;  %v164_v34 = vld [vmem:[%s4986_s1 + $0x70] sm:$0xff] }
   0xc   :  { %532 = vmatpush1.msra.mxu1 %v236_v19  ;;  %300 = vmatprep.subr.mxu0 %v171_v20  ;;  %v230_v31 = vld [vmem:[%s4986_s1 + $0x280] sm:$0xff]  ;;  %v229_v33 = vld [vmem:[%s4986_s1 + $0x278] sm:$0xff]  ;;  %v228_v35 = vld [vmem:[%s4986_s1 + $0x270] sm:$0xff] }
   0xd   :  { %533 = vmatprep.subr.mxu1 %v235_v21  ;;  %301 = vmatpush1.msra.mxu0 %v170_v22  ;;  %v163_v36 = vld [vmem:[%s4986_s1 + $0x68] sm:$0xff]  ;;  %v162_v38 = vld [vmem:[%s4986_s1 + $0x60] sm:$0xff]  ;;  %v161_v40 = vld [vmem:[%s4986_s1 + $0x58] sm:$0xff] }
   0xe   :  { %534 = vmatpush1.msra.mxu1 %v234_v23  ;;  %302 = vmatprep.subr.mxu0 %v169_v24  ;;  %v227_v37 = vld [vmem:[%s4986_s1 + $0x268] sm:$0xff]  ;;  %v226_v39 = vld [vmem:[%s4986_s1 + $0x260] sm:$0xff]  ;;  %v225_v41 = vld [vmem:[%s4986_s1 + $0x258] sm:$0xff] }
   0xf   :  { %535 = vmatprep.subr.mxu1 %v233_v25  ;;  %303 = vmatpush1.msra.mxu0 %v168_v26  ;;  %v160_v42 = vld [vmem:[%s4986_s1 + $0x50] sm:$0xff]  ;;  %v159_v44 = vld [vmem:[%s4986_s1 + $0x48] sm:$0xff]  ;;  %v158_v46 = vld [vmem:[%s4986_s1 + $0x40] sm:$0xff] }
  0x10   :  { %536 = vmatpush1.msra.mxu1 %v232_v27  ;;  %304 = vmatprep.subr.mxu0 %v167_v28  ;;  %v224_v43 = vld [vmem:[%s4986_s1 + $0x250] sm:$0xff]  ;;  %v223_v45 = vld [vmem:[%s4986_s1 + $0x248] sm:$0xff]  ;;  %v222_v47 = vld [vmem:[%s4986_s1 + $0x240] sm:$0xff] }
  0x11   :  { %537 = vmatprep.subr.mxu1 %v231_v29  ;;  %305 = vmatpush1.msra.mxu0 %v166_v30  ;;  %v157_v48 = vld [vmem:[%s4986_s1 + $0x38] sm:$0xff]  ;;  %v156_v50 = vld [vmem:[%s4986_s1 + $0x30] sm:$0xff]  ;;  %v155_v52 = vld [vmem:[%s4986_s1 + $0x28] sm:$0xff] }
  0x12   :  { %538 = vmatpush1.msra.mxu1 %v230_v31  ;;  %306 = vmatprep.subr.mxu0 %v165_v32  ;;  %v221_v49 = vld [vmem:[%s4986_s1 + $0x238] sm:$0xff]  ;;  %v220_v51 = vld [vmem:[%s4986_s1 + $0x230] sm:$0xff]  ;;  %v219_v53 = vld [vmem:[%s4986_s1 + $0x228] sm:$0xff] }
  0x13   :  { %539 = vmatprep.subr.mxu1 %v229_v33  ;;  %307 = vmatpush1.msra.mxu0 %v164_v34  ;;  %v154_v54 = vld [vmem:[%s4986_s1 + $0x20] sm:$0xff]  ;;  %v153_v56 = vld [vmem:[%s4986_s1 + $0x18] sm:$0xff]  ;;  %v152_v58 = vld [vmem:[%s4986_s1 + $0x10] sm:$0xff] }
  0x14   :  { %540 = vmatpush1.msra.mxu1 %v228_v35  ;;  %308 = vmatprep.subr.mxu0 %v163_v36  ;;  %v218_v55 = vld [vmem:[%s4986_s1 + $0x220] sm:$0xff]  ;;  %v217_v57 = vld [vmem:[%s4986_s1 + $0x218] sm:$0xff]  ;;  %v216_v59 = vld [vmem:[%s4986_s1 + $0x210] sm:$0xff] }
  0x15   :  { %541 = vmatprep.subr.mxu1 %v227_v37  ;;  %309 = vmatpush1.msra.mxu0 %v162_v38  ;;  %v151_v60 = vld [vmem:[%s4986_s1 + $0x8] sm:$0xff]  ;;  %v150_v62 = vld [vmem:[%s4986_s1] sm:$0xff]  ;;  %v213_v0 = vld [vmem:[%s4986_s1 + $0x1f8] sm:$0xff] }
  0x16   :  { %542 = vmatpush1.msra.mxu1 %v226_v39  ;;  %310 = vmatprep.subr.mxu0 %v161_v40  ;;  %v215_v61 = vld [vmem:[%s4986_s1 + $0x208] sm:$0xff]  ;;  %v214_v63 = vld [vmem:[%s4986_s1 + $0x200] sm:$0xff]  ;;  %v277_v1 = vld [vmem:[%s4986_s1 + $0x3f8] sm:$0xff] }
  0x17   :  { %543 = vmatprep.subr.mxu1 %v225_v41  ;;  %311 = vmatpush1.msra.mxu0 %v160_v42  ;;  %v212_v2 = vld [vmem:[%s4986_s1 + $0x1f0] sm:$0xff]  ;;  %v211_v4 = vld [vmem:[%s4986_s1 + $0x1e8] sm:$0xff]  ;;  %v210_v6 = vld [vmem:[%s4986_s1 + $0x1e0] sm:$0xff] }
  0x18   :  { %544 = vmatpush1.msra.mxu1 %v224_v43  ;;  %312 = vmatprep.subr.mxu0 %v159_v44  ;;  %v276_v3 = vld [vmem:[%s4986_s1 + $0x3f0] sm:$0xff]  ;;  %v275_v5 = vld [vmem:[%s4986_s1 + $0x3e8] sm:$0xff]  ;;  %v274_v7 = vld [vmem:[%s4986_s1 + $0x3e0] sm:$0xff] }
  0x19   :  { %545 = vmatprep.subr.mxu1 %v223_v45  ;;  %313 = vmatpush1.msra.mxu0 %v158_v46  ;;  %v209_v8 = vld [vmem:[%s4986_s1 + $0x1d8] sm:$0xff]  ;;  %v208_v10 = vld [vmem:[%s4986_s1 + $0x1d0] sm:$0xff]  ;;  %v207_v12 = vld [vmem:[%s4986_s1 + $0x1c8] sm:$0xff] }
  0x1a   :  { %546 = vmatpush1.msra.mxu1 %v222_v47  ;;  %314 = vmatprep.subr.mxu0 %v157_v48  ;;  %v273_v9 = vld [vmem:[%s4986_s1 + $0x3d8] sm:$0xff]  ;;  %v272_v11 = vld [vmem:[%s4986_s1 + $0x3d0] sm:$0xff]  ;;  %v271_v13 = vld [vmem:[%s4986_s1 + $0x3c8] sm:$0xff] }
  0x1b   :  { %547 = vmatprep.subr.mxu1 %v221_v49  ;;  %315 = vmatpush1.msra.mxu0 %v156_v50  ;;  %v206_v14 = vld [vmem:[%s4986_s1 + $0x1c0] sm:$0xff]  ;;  %v205_v16 = vld [vmem:[%s4986_s1 + $0x1b8] sm:$0xff]  ;;  %v204_v18 = vld [vmem:[%s4986_s1 + $0x1b0] sm:$0xff] }
  0x1c   :  { %548 = vmatpush1.msra.mxu1 %v220_v51  ;;  %316 = vmatprep.subr.mxu0 %v155_v52  ;;  %v270_v15 = vld [vmem:[%s4986_s1 + $0x3c0] sm:$0xff]  ;;  %v269_v17 = vld [vmem:[%s4986_s1 + $0x3b8] sm:$0xff]  ;;  %v268_v19 = vld [vmem:[%s4986_s1 + $0x3b0] sm:$0xff] }
  0x1d   :  { %549 = vmatprep.subr.mxu1 %v219_v53  ;;  %317 = vmatpush1.msra.mxu0 %v154_v54  ;;  %v203_v20 = vld [vmem:[%s4986_s1 + $0x1a8] sm:$0xff]  ;;  %v202_v22 = vld [vmem:[%s4986_s1 + $0x1a0] sm:$0xff]  ;;  %v201_v24 = vld [vmem:[%s4986_s1 + $0x198] sm:$0xff] }
  0x1e   :  { %550 = vmatpush1.msra.mxu1 %v218_v55  ;;  %318 = vmatprep.subr.mxu0 %v153_v56  ;;  %v267_v21 = vld [vmem:[%s4986_s1 + $0x3a8] sm:$0xff]  ;;  %v266_v23 = vld [vmem:[%s4986_s1 + $0x3a0] sm:$0xff]  ;;  %v265_v25 = vld [vmem:[%s4986_s1 + $0x398] sm:$0xff] }
  0x1f   :  { %551 = vmatprep.subr.mxu1 %v217_v57  ;;  %319 = vmatpush1.msra.mxu0 %v152_v58  ;;  %v200_v26 = vld [vmem:[%s4986_s1 + $0x190] sm:$0xff]  ;;  %v199_v28 = vld [vmem:[%s4986_s1 + $0x188] sm:$0xff]  ;;  %v198_v30 = vld [vmem:[%s4986_s1 + $0x180] sm:$0xff] }
  0x20   :  { %552 = vmatpush1.msra.mxu1 %v216_v59  ;;  %320 = vmatprep.subr.mxu0 %v151_v60  ;;  %v264_v27 = vld [vmem:[%s4986_s1 + $0x390] sm:$0xff]  ;;  %v263_v29 = vld [vmem:[%s4986_s1 + $0x388] sm:$0xff]  ;;  %v262_v31 = vld [vmem:[%s4986_s1 + $0x380] sm:$0xff] }
  0x21   :  { %553 = vmatprep.subr.mxu1 %v215_v61  ;;  %321 = vmatpush1.msra.mxu0 %v150_v62  ;;  %v197_v32 = vld [vmem:[%s4986_s1 + $0x178] sm:$0xff]  ;;  %v196_v34 = vld [vmem:[%s4986_s1 + $0x170] sm:$0xff]  ;;  %v195_v36 = vld [vmem:[%s4986_s1 + $0x168] sm:$0xff] }
  0x22   :  { %554 = vmatpush1.msra.mxu1 %v214_v63  ;;  %322 = vmatprep.subr.mxu0 %v213_v0  ;;  %v261_v33 = vld [vmem:[%s4986_s1 + $0x378] sm:$0xff]  ;;  %v260_v35 = vld [vmem:[%s4986_s1 + $0x370] sm:$0xff]  ;;  %v259_v37 = vld [vmem:[%s4986_s1 + $0x368] sm:$0xff] }
  0x23   :  { %555 = vmatprep.subr.mxu1 %v277_v1  ;;  %323 = vmatpush2.msra.mxu0 %v212_v2  ;;  %v194_v38 = vld [vmem:[%s4986_s1 + $0x160] sm:$0xff]  ;;  %v193_v40 = vld [vmem:[%s4986_s1 + $0x158] sm:$0xff]  ;;  %v192_v42 = vld [vmem:[%s4986_s1 + $0x150] sm:$0xff] }
  0x24   :  { %556 = vmatpush2.msra.mxu1 %v276_v3  ;;  %324 = vmatprep.subr.mxu0 %v211_v4  ;;  %v258_v39 = vld [vmem:[%s4986_s1 + $0x360] sm:$0xff]  ;;  %v257_v41 = vld [vmem:[%s4986_s1 + $0x358] sm:$0xff]  ;;  %v256_v43 = vld [vmem:[%s4986_s1 + $0x350] sm:$0xff] }
  0x25   :  { %557 = vmatprep.subr.mxu1 %v275_v5  ;;  %325 = vmatpush2.msra.mxu0 %v210_v6  ;;  %v191_v44 = vld [vmem:[%s4986_s1 + $0x148] sm:$0xff]  ;;  %v190_v46 = vld [vmem:[%s4986_s1 + $0x140] sm:$0xff]  ;;  %v189_v48 = vld [vmem:[%s4986_s1 + $0x138] sm:$0xff] }
  0x26   :  { %558 = vmatpush2.msra.mxu1 %v274_v7  ;;  %326 = vmatprep.subr.mxu0 %v209_v8  ;;  %v255_v45 = vld [vmem:[%s4986_s1 + $0x348] sm:$0xff]  ;;  %v254_v47 = vld [vmem:[%s4986_s1 + $0x340] sm:$0xff]  ;;  %v253_v49 = vld [vmem:[%s4986_s1 + $0x338] sm:$0xff] }
  0x27   :  { %559 = vmatprep.subr.mxu1 %v273_v9  ;;  %327 = vmatpush2.msra.mxu0 %v208_v10  ;;  %v188_v50 = vld [vmem:[%s4986_s1 + $0x130] sm:$0xff]  ;;  %v187_v52 = vld [vmem:[%s4986_s1 + $0x128] sm:$0xff]  ;;  %v186_v54 = vld [vmem:[%s4986_s1 + $0x120] sm:$0xff] }
  0x28   :  { %560 = vmatpush2.msra.mxu1 %v272_v11  ;;  %328 = vmatprep.subr.mxu0 %v207_v12  ;;  %v252_v51 = vld [vmem:[%s4986_s1 + $0x330] sm:$0xff]  ;;  %v251_v53 = vld [vmem:[%s4986_s1 + $0x328] sm:$0xff]  ;;  %v250_v55 = vld [vmem:[%s4986_s1 + $0x320] sm:$0xff] }
  0x29   :  { %561 = vmatprep.subr.mxu1 %v271_v13  ;;  %329 = vmatpush2.msra.mxu0 %v206_v14  ;;  %v185_v56 = vld [vmem:[%s4986_s1 + $0x118] sm:$0xff]  ;;  %v184_v58 = vld [vmem:[%s4986_s1 + $0x110] sm:$0xff]  ;;  %v183_v60 = vld [vmem:[%s4986_s1 + $0x108] sm:$0xff] }
  0x2a   :  { %562 = vmatpush2.msra.mxu1 %v270_v15  ;;  %330 = vmatprep.subr.mxu0 %v205_v16  ;;  %v249_v57 = vld [vmem:[%s4986_s1 + $0x318] sm:$0xff]  ;;  %v248_v59 = vld [vmem:[%s4986_s1 + $0x310] sm:$0xff]  ;;  %v247_v61 = vld [vmem:[%s4986_s1 + $0x308] sm:$0xff] }
  0x2b   :  { %563 = vmatprep.subr.mxu1 %v269_v17  ;;  %331 = vmatpush2.msra.mxu0 %v204_v18  ;;  %v182_v62 = vld [vmem:[%s4986_s1 + $0x100] sm:$0xff]  ;;  %v39_v63 = vld [vmem:[%s4987_s0 + $0x8] sm:$0xff]  ;;  %v41_v1 = vld [vmem:[%s4987_s0 + $0x18] sm:$0xff] }
  0x2c   :  { %564 = vmatpush2.msra.mxu1 %v268_v19  ;;  %332 = vmatprep.subr.mxu0 %v203_v20  ;;  %v246_v0 = vld [vmem:[%s4986_s1 + $0x300] sm:$0xff]  ;;  %v40_v3 = vld [vmem:[%s4987_s0 + $0x10] sm:$0xff]  ;;  %v43_v4 = vld [vmem:[%s4987_s0 + $0x28] sm:$0xff] }
  0x2d   :  { %565 = vmatprep.subr.mxu1 %v267_v21  ;;  %333 = vmatpush2.msra.mxu0 %v202_v22  ;;  %v38_v2 = vld [vmem:[%s4987_s0] sm:$0xff]  ;;  %v45_v5 = vld [vmem:[%s4987_s0 + $0x38] sm:$0xff]  ;;  %v44_v7 = vld [vmem:[%s4987_s0 + $0x30] sm:$0xff] }
  0x2e   :  { %566 = vmatpush2.msra.mxu1 %v266_v23  ;;  %334 = vmatprep.subr.mxu0 %v201_v24  ;;  %v42_v6 = vld [vmem:[%s4987_s0 + $0x20] sm:$0xff]  ;;  %v47_v8 = vld [vmem:[%s4987_s0 + $0x48] sm:$0xff]  ;;  %v49_v9 = vld [vmem:[%s4987_s0 + $0x58] sm:$0xff] }
  0x2f   :  { %567 = vmatprep.subr.mxu1 %v265_v25  ;;  %335 = vmatpush2.msra.mxu0 %v200_v26  ;;  %v46_v10 = vld [vmem:[%s4987_s0 + $0x40] sm:$0xff]  ;;  %v48_v11 = vld [vmem:[%s4987_s0 + $0x50] sm:$0xff]  ;;  %v51_v12 = vld [vmem:[%s4987_s0 + $0x68] sm:$0xff] }
  0x30   :  { %568 = vmatpush2.msra.mxu1 %v264_v27  ;;  %336 = vmatprep.subr.mxu0 %v199_v28  ;;  %v53_v13 = vld [vmem:[%s4987_s0 + $0x78] sm:$0xff]  ;;  %v50_v14 = vld [vmem:[%s4987_s0 + $0x60] sm:$0xff]  ;;  %v52_v15 = vld [vmem:[%s4987_s0 + $0x70] sm:$0xff] }
  0x31   :  { %569 = vmatprep.subr.mxu1 %v263_v29  ;;  %337 = vmatpush2.msra.mxu0 %v198_v30  ;;  %v55_v16 = vld [vmem:[%s4987_s0 + $0x88] sm:$0xff]  ;;  %v57_v17 = vld [vmem:[%s4987_s0 + $0x98] sm:$0xff]  ;;  %v54_v18 = vld [vmem:[%s4987_s0 + $0x80] sm:$0xff] }
  0x32   :  { %570 = vmatpush2.msra.mxu1 %v262_v31  ;;  %338 = vmatprep.subr.mxu0 %v197_v32  ;;  %v56_v19 = vld [vmem:[%s4987_s0 + $0x90] sm:$0xff]  ;;  %v59_v20 = vld [vmem:[%s4987_s0 + $0xa8] sm:$0xff]  ;;  %v61_v21 = vld [vmem:[%s4987_s0 + $0xb8] sm:$0xff] }
  0x33   :  { %571 = vmatprep.subr.mxu1 %v261_v33  ;;  %339 = vmatpush2.msra.mxu0 %v196_v34  ;;  %v2290_v22 = vld [vmem:[%s4988_s3 + $0x1f8] sm:$0xff]  ;;  %v2289_v23 = vld [vmem:[%s4988_s3 + $0x1f0] sm:$0xff]  ;;  %v2288_v24 = vld [vmem:[%s4988_s3 + $0x1e8] sm:$0xff] }
  0x34   :  { %572 = vmatpush2.msra.mxu1 %v260_v35  ;;  %340 = vmatprep.subr.mxu0 %v195_v36  ;;  %v58_v25 = vld [vmem:[%s4987_s0 + $0xa0] sm:$0xff]  ;;  %v60_v26 = vld [vmem:[%s4987_s0 + $0xb0] sm:$0xff]  ;;  %v63_v27 = vld [vmem:[%s4987_s0 + $0xc8] sm:$0xff] }
  0x35   :  { %573 = vmatprep.subr.mxu1 %v259_v37  ;;  %341 = vmatpush2.msra.mxu0 %v194_v38  ;;  %v65_v28 = vld [vmem:[%s4987_s0 + $0xd8] sm:$0xff]  ;;  %v2287_v29 = vld [vmem:[%s4988_s3 + $0x1e0] sm:$0xff]  ;;  %v64_v32 = vld [vmem:[%s4987_s0 + $0xd0] sm:$0xff] }
  0x36   :  { %574 = vmatpush2.msra.mxu1 %v258_v39  ;;  %342 = vmatprep.subr.mxu0 %v193_v40  ;;  %v2286_v30 = vld [vmem:[%s4988_s3 + $0x1d8] sm:$0xff]  ;;  %v62_v31 = vld [vmem:[%s4987_s0 + $0xc0] sm:$0xff]  ;;  %v67_v33 = vld [vmem:[%s4987_s0 + $0xe8] sm:$0xff] }
  0x37   :  { %575 = vmatprep.subr.mxu1 %v257_v41  ;;  %343 = vmatpush2.msra.mxu0 %v192_v42  ;;  %v69_v34 = vld [vmem:[%s4987_s0 + $0xf8] sm:$0xff]  ;;  %v2285_v35 = vld [vmem:[%s4988_s3 + $0x1d0] sm:$0xff]  ;;  %v2284_v36 = vld [vmem:[%s4988_s3 + $0x1c8] sm:$0xff] }
  0x38   :  { %576 = vmatpush2.msra.mxu1 %v256_v43  ;;  %344 = vmatprep.subr.mxu0 %v191_v44  ;;  %v66_v37 = vld [vmem:[%s4987_s0 + $0xe0] sm:$0xff]  ;;  %v68_v38 = vld [vmem:[%s4987_s0 + $0xf0] sm:$0xff]  ;;  %v71_v39 = vld [vmem:[%s4987_s0 + $0x108] sm:$0xff] }
  0x39   :  { %577 = vmatprep.subr.mxu1 %v255_v45  ;;  %345 = vmatpush2.msra.mxu0 %v190_v46  ;;  %v73_v40 = vld [vmem:[%s4987_s0 + $0x118] sm:$0xff]  ;;  %v2283_v41 = vld [vmem:[%s4988_s3 + $0x1c0] sm:$0xff]  ;;  %v72_v43 = vld [vmem:[%s4987_s0 + $0x110] sm:$0xff] }
  0x3a   :  { %578 = vmatpush2.msra.mxu1 %v254_v47  ;;  %346 = vmatprep.subr.mxu0 %v189_v48  ;;  %v70_v42 = vld [vmem:[%s4987_s0 + $0x100] sm:$0xff]  ;;  %v75_v44 = vld [vmem:[%s4987_s0 + $0x128] sm:$0xff]  ;;  %v77_v45 = vld [vmem:[%s4987_s0 + $0x138] sm:$0xff] }
  0x3b   :  { %579 = vmatprep.subr.mxu1 %v253_v49  ;;  %347 = vmatpush2.msra.mxu0 %v188_v50  ;;  %v74_v46 = vld [vmem:[%s4987_s0 + $0x120] sm:$0xff]  ;;  %v76_v47 = vld [vmem:[%s4987_s0 + $0x130] sm:$0xff]  ;;  %v79_v48 = vld [vmem:[%s4987_s0 + $0x148] sm:$0xff] }
  0x3c   :  { %580 = vmatpush2.msra.mxu1 %v252_v51  ;;  %348 = vmatprep.subr.mxu0 %v187_v52  ;;  %v81_v49 = vld [vmem:[%s4987_s0 + $0x158] sm:$0xff]  ;;  %v78_v50 = vld [vmem:[%s4987_s0 + $0x140] sm:$0xff]  ;;  %v80_v51 = vld [vmem:[%s4987_s0 + $0x150] sm:$0xff] }
  0x3d   :  { %581 = vmatprep.subr.mxu1 %v251_v53  ;;  %349 = vmatpush2.msra.mxu0 %v186_v54  ;;  %v83_v52 = vld [vmem:[%s4987_s0 + $0x168] sm:$0xff]  ;;  %v85_v53 = vld [vmem:[%s4987_s0 + $0x178] sm:$0xff]  ;;  %v82_v54 = vld [vmem:[%s4987_s0 + $0x160] sm:$0xff] }
  0x3e   :  { %582 = vmatpush2.msra.mxu1 %v250_v55  ;;  %350 = vmatprep.subr.mxu0 %v185_v56  ;;  %v84_v55 = vld [vmem:[%s4987_s0 + $0x170] sm:$0xff]  ;;  %v87_v56 = vld [vmem:[%s4987_s0 + $0x188] sm:$0xff] }
  0x3f   :  { %583 = vmatprep.subr.mxu1 %v249_v57  ;;  %351 = vmatpush2.msra.mxu0 %v184_v58  ;;  %v89_v57 = vld [vmem:[%s4987_s0 + $0x198] sm:$0xff]  ;;  %v86_v58 = vld [vmem:[%s4987_s0 + $0x180] sm:$0xff] }
  0x40   :  { %584 = vmatpush2.msra.mxu1 %v248_v59  ;;  %352 = vmatprep.subr.mxu0 %v183_v60  ;;  %v88_v59 = vld [vmem:[%s4987_s0 + $0x190] sm:$0xff]  ;;  %v91_v60 = vld [vmem:[%s4987_s0 + $0x1a8] sm:$0xff] }
  0x41   :  { %585 = vmatprep.subr.mxu1 %v247_v61  ;;  %353 = vmatpush2.msra.mxu0 %v182_v62  ;;  %v93_v61 = vld [vmem:[%s4987_s0 + $0x1b8] sm:$0xff]  ;;  %v90_v62 = vld [vmem:[%s4987_s0 + $0x1a0] sm:$0xff] }
  0x42   :  { %354 = vmatprep.mubr.f32.mxu0 %v39_v63  ;;  %586 = vmatpush2.msra.mxu1 %v246_v0  ;;  %v92_v63 = vld [vmem:[%s4987_s0 + $0x1b0] sm:$0xff]  ;;  %v95_v0 = vld [vmem:[%s4987_s0 + $0x1c8] sm:$0xff] }
  0x43   :  { %587 = vmatprep.mubr.f32.mxu1 %v41_v1  ;;  %355 = vmatmul.mubr.f32.vlgmr.msra.gmra.mxu0 %v38_v2  ;;  %v97_v1 = vld [vmem:[%s4987_s0 + $0x1d8] sm:$0xff]  ;;  %v94_v2 = vld [vmem:[%s4987_s0 + $0x1c0] sm:$0xff] }
  0x44   :  { %588 = vmatmul.mubr.f32.vlgmr.msra.gmra.mxu1 %v40_v3  ;;  %360 = vmatprep.mubr.f32.mxu0 %v43_v4  ;;  %v96_v3 = vld [vmem:[%s4987_s0 + $0x1d0] sm:$0xff]  ;;  %v99_v4 = vld [vmem:[%s4987_s0 + $0x1e8] sm:$0xff] }
  0x45   :  { %593 = vmatprep.mubr.f32.mxu1 %v45_v5  ;;  %919 = vmatprep.subr.mxu0 %v2290_v22  ;;  %v101_v5 = vld [vmem:[%s4987_s0 + $0x1f8] sm:$0xff]  ;;  %v115_v22 = vld [vmem:[%s4987_s0 + $0x268] sm:$0xff] }
  0x46   :  { %920 = vmatpush1.msra.mxu0 %v2289_v23  ;;  %v117_v23 = vld [vmem:[%s4987_s0 + $0x278] sm:$0xff] }
  0x47   :  { %361 = vmatmul.mubr.f32.gmra.mxu0 %v42_v6  ;;  %921 = vmatprep.subr.mxu0 %v2288_v24  ;;  %v98_v6 = vld [vmem:[%s4987_s0 + $0x1e0] sm:$0xff] }
  0x48   :  { %594 = vmatmul.mubr.f32.gmra.mxu1 %v44_v7  ;;  %366 = vmatprep.mubr.f32.mxu0 %v47_v8  ;;  %v100_v7 = vld [vmem:[%s4987_s0 + $0x1f0] sm:$0xff]  ;;  %v103_v8 = vld [vmem:[%s4987_s0 + $0x208] sm:$0xff]  ;;  %v114_v24 = vld [vmem:[%s4987_s0 + $0x260] sm:$0xff] }
  0x49   :  { %599 = vmatprep.mubr.f32.mxu1 %v49_v9  ;;  %922 = vmatpush1.msra.mxu0 %v2287_v29  ;;  %v105_v9 = vld [vmem:[%s4987_s0 + $0x218] sm:$0xff]  ;;  %v118_v29 = vld [vmem:[%s4987_s0 + $0x280] sm:$0xff] }
  0x4a   :  { %923 = vmatprep.subr.mxu0 %v2286_v30  ;;  %v120_v30 = vld [vmem:[%s4987_s0 + $0x290] sm:$0xff] }
  0x4b   :  { %367 = vmatmul.mubr.f32.gmra.mxu0 %v46_v10  ;;  %v102_v10 = vld [vmem:[%s4987_s0 + $0x200] sm:$0xff] }
  0x4c   :  { %600 = vmatmul.mubr.f32.gmra.mxu1 %v48_v11  ;;  %372 = vmatprep.mubr.f32.mxu0 %v51_v12  ;;  %v104_v11 = vld [vmem:[%s4987_s0 + $0x210] sm:$0xff]  ;;  %v107_v12 = vld [vmem:[%s4987_s0 + $0x228] sm:$0xff] }
  0x4d   :  { %605 = vmatprep.mubr.f32.mxu1 %v53_v13  ;;  %924 = vmatpush1.msra.mxu0 %v2285_v35  ;;  %v109_v13 = vld [vmem:[%s4987_s0 + $0x238] sm:$0xff]  ;;  %v884_v35 = vld [vmem:[%s4988_s3 + $0xf0] sm:$0xff] }
  0x4e   :  { %925 = vmatprep.subr.mxu0 %v2284_v36  ;;  %v122_v36 = vld [vmem:[%s4987_s0 + $0x2a0] sm:$0xff] }
  0x4f   :  { %373 = vmatmul.mubr.f32.gmra.mxu0 %v50_v14  ;;  %v106_v14 = vld [vmem:[%s4987_s0 + $0x220] sm:$0xff] }
  0x50   :  { %606 = vmatmul.mubr.f32.gmra.mxu1 %v52_v15  ;;  %378 = vmatprep.mubr.f32.mxu0 %v55_v16  ;;  %v108_v15 = vld [vmem:[%s4987_s0 + $0x230] sm:$0xff]  ;;  %v111_v16 = vld [vmem:[%s4987_s0 + $0x248] sm:$0xff] }
  0x51   :  { %611 = vmatprep.mubr.f32.mxu1 %v57_v17  ;;  %926 = vmatpush1.msra.mxu0 %v2283_v41  ;;  %v113_v17 = vld [vmem:[%s4987_s0 + $0x258] sm:$0xff]  ;;  %v2277_v41 = vld [vmem:[%s4988_s3 + $0x190] sm:$0xff] }
  0x53   :  { %379 = vmatmul.mubr.f32.gmra.mxu0 %v54_v18  ;;  %v110_v18 = vld [vmem:[%s4987_s0 + $0x240] sm:$0xff] }
  0x54   :  { %612 = vmatmul.mubr.f32.gmra.mxu1 %v56_v19  ;;  %384 = vmatprep.mubr.f32.mxu0 %v59_v20  ;;  %v112_v19 = vld [vmem:[%s4987_s0 + $0x250] sm:$0xff]  ;;  %v2282_v20 = vld [vmem:[%s4988_s3 + $0x1b8] sm:$0xff] }
  0x55   :  { %617 = vmatprep.mubr.f32.mxu1 %v61_v21  ;;  %v2281_v21 = vld [vmem:[%s4988_s3 + $0x1b0] sm:$0xff]  ;;  %927 = vmatprep.subr.mxu0 %v2282_v20  ;;  %v873_v20 = vld [vmem:[%s4988_s3 + $0x98] sm:$0xff] }
  0x56   :  { %928 = vmatpush1.msra.mxu0 %v2281_v21  ;;  %v872_v21 = vld [vmem:[%s4988_s3 + $0x90] sm:$0xff] }
  0x57   :  { %385 = vmatmul.mubr.f32.gmra.mxu0 %v58_v25  ;;  %v116_v25 = vld [vmem:[%s4987_s0 + $0x270] sm:$0xff] }
  0x58   :  { %618 = vmatmul.mubr.f32.gmra.mxu1 %v60_v26  ;;  %390 = vmatprep.mubr.f32.mxu0 %v63_v27  ;;  %v119_v26 = vld [vmem:[%s4987_s0 + $0x288] sm:$0xff]  ;;  %v121_v27 = vld [vmem:[%s4987_s0 + $0x298] sm:$0xff] }
  0x59   :  { %623 = vmatprep.mubr.f32.mxu1 %v65_v28  ;;  %v2280_v28 = vld [vmem:[%s4988_s3 + $0x1a8] sm:$0xff] }
  0x5a   :  { %929 = vmatprep.subr.mxu0 %v2280_v28  ;;  %v867_v28 = vld [vmem:[%s4988_s3 + $0x68] sm:$0xff] }
  0x5b   :  { %391 = vmatmul.mubr.f32.gmra.mxu0 %v62_v31  ;;  %v2279_v31 = vld [vmem:[%s4988_s3 + $0x1a0] sm:$0xff] }
  0x5c   :  { %624 = vmatmul.mubr.f32.gmra.mxu1 %v64_v32  ;;  %396 = vmatprep.mubr.f32.mxu0 %v67_v33  ;;  %v123_v32 = vld [vmem:[%s4987_s0 + $0x2a8] sm:$0xff]  ;;  %v125_v33 = vld [vmem:[%s4987_s0 + $0x2b8] sm:$0xff] }
  0x5d   :  { %629 = vmatprep.mubr.f32.mxu1 %v69_v34  ;;  %930 = vmatpush1.msra.mxu0 %v2279_v31  ;;  %v885_v34 = vld [vmem:[%s4988_s3 + $0xf8] sm:$0xff] }
  0x5e   :  { %1044 = vmatprep.subr.mxu1 %v885_v34  ;;  %v865_v31 = vld [vmem:[%s4988_s3 + $0x58] sm:$0xff]  ;;  %v863_v34 = vld [vmem:[%s4988_s3 + $0x48] sm:$0xff] }
  0x5f   :  { %397 = vmatmul.mubr.f32.gmra.mxu0 %v66_v37  ;;  %v124_v37 = vld [vmem:[%s4987_s0 + $0x2b0] sm:$0xff]  ;;  %1045 = vmatpush1.msra.mxu1 %v884_v35  ;;  %v862_v35 = vld [vmem:[%s4988_s3 + $0x40] sm:$0xff] }
  0x60   :  { %630 = vmatmul.mubr.f32.gmra.mxu1 %v68_v38  ;;  %402 = vmatprep.mubr.f32.mxu0 %v71_v39  ;;  %v127_v38 = vld [vmem:[%s4987_s0 + $0x2c8] sm:$0xff]  ;;  %v129_v39 = vld [vmem:[%s4987_s0 + $0x2d8] sm:$0xff] }
  0x61   :  { %635 = vmatprep.mubr.f32.mxu1 %v73_v40  ;;  %v2278_v40 = vld [vmem:[%s4988_s3 + $0x198] sm:$0xff] }
  0x62   :  { %931 = vmatprep.subr.mxu0 %v2278_v40  ;;  %v2261_v40 = vld [vmem:[%s4988_s3 + $0x110] sm:$0xff] }
  0x63   :  { %403 = vmatmul.mubr.f32.gmra.mxu0 %v70_v42  ;;  %v126_v42 = vld [vmem:[%s4987_s0 + $0x2c0] sm:$0xff] }
  0x64   :  { %636 = vmatmul.mubr.f32.gmra.mxu1 %v72_v43  ;;  %408 = vmatprep.mubr.f32.mxu0 %v75_v44  ;;  %v128_v43 = vld [vmem:[%s4987_s0 + $0x2d0] sm:$0xff]  ;;  %v883_v44 = vld [vmem:[%s4988_s3 + $0xe8] sm:$0xff] }
  0x65   :  { %641 = vmatprep.mubr.f32.mxu1 %v77_v45  ;;  %v131_v45 = vld [vmem:[%s4987_s0 + $0x2e8] sm:$0xff]  ;;  %1046 = vmatprep.subr.mxu1 %v883_v44 }
  0x66   :  { %932 = vmatpush1.msra.mxu0 %v2277_v41  ;;  %v858_v41 = vld [vmem:[%s4988_s3 + $0x20] sm:$0xff]  ;;  %v855_v44 = vld [vmem:[%s4988_s3 + $0x8] sm:$0xff] }
  0x67   :  { %409 = vmatmul.mubr.f32.gmra.mxu0 %v74_v46  ;;  %v133_v46 = vld [vmem:[%s4987_s0 + $0x2f8] sm:$0xff] }
  0x68   :  { %642 = vmatmul.mubr.f32.gmra.mxu1 %v76_v47  ;;  %414 = vmatprep.mubr.f32.mxu0 %v79_v48  ;;  %v882_v47 = vld [vmem:[%s4988_s3 + $0xe0] sm:$0xff] }
  0x69   :  { %647 = vmatprep.mubr.f32.mxu1 %v81_v49  ;;  %v130_v48 = vld [vmem:[%s4987_s0 + $0x2e0] sm:$0xff]  ;;  %v132_v49 = vld [vmem:[%s4987_s0 + $0x2f0] sm:$0xff]  ;;  %1047 = vmatpush1.msra.mxu1 %v882_v47  ;;  %v2260_v47 = vld [vmem:[%s4988_s3 + $0x108] sm:$0xff] }
  0x6b   :  { %415 = vmatmul.mubr.f32.gmra.mxu0 %v78_v50  ;;  %v2276_v50 = vld [vmem:[%s4988_s3 + $0x188] sm:$0xff] }
  0x6c   :  { %648 = vmatmul.mubr.f32.gmra.mxu1 %v80_v51  ;;  %420 = vmatprep.mubr.f32.mxu0 %v83_v52  ;;  %v135_v51 = vld [vmem:[%s4987_s0 + $0x308] sm:$0xff]  ;;  %v137_v52 = vld [vmem:[%s4987_s0 + $0x318] sm:$0xff] }
  0x6d   :  { %653 = vmatprep.mubr.f32.mxu1 %v85_v53  ;;  %933 = vmatprep.subr.mxu0 %v2276_v50  ;;  %v2275_v53 = vld [vmem:[%s4988_s3 + $0x180] sm:$0xff]  ;;  %v2322_v50 = vld [vmem:[%s4988_s3 + $0x2f8] sm:$0xff] }
  0x6e   :  { %934 = vmatpush1.msra.mxu0 %v2275_v53 }
  0x6f   :  { %421 = vmatmul.mubr.f32.gmra.mxu0 %v82_v54  ;;  %v134_v54 = vld [vmem:[%s4987_s0 + $0x300] sm:$0xff] }
  0x70   :  { %654 = vmatmul.mubr.f32.gmra.mxu1 %v84_v55  ;;  %426 = vmatprep.mubr.f32.mxu0 %v87_v56  ;;  %v136_v55 = vld [vmem:[%s4987_s0 + $0x310] sm:$0xff]  ;;  %v881_v56 = vld [vmem:[%s4988_s3 + $0xd8] sm:$0xff] }
  0x71   :  { %659 = vmatprep.mubr.f32.mxu1 %v89_v57  ;;  %v880_v57 = vld [vmem:[%s4988_s3 + $0xd0] sm:$0xff]  ;;  %1048 = vmatprep.subr.mxu1 %v881_v56 }
  0x72   :  { %1049 = vmatpush1.msra.mxu1 %v880_v57 }
  0x73   :  { %427 = vmatmul.mubr.f32.gmra.mxu0 %v86_v58  ;;  %v139_v58 = vld [vmem:[%s4987_s0 + $0x328] sm:$0xff] }
  0x74   :  { %660 = vmatmul.mubr.f32.gmra.mxu1 %v88_v59  ;;  %432 = vmatprep.mubr.f32.mxu0 %v91_v60  ;;  %v141_v59 = vld [vmem:[%s4987_s0 + $0x338] sm:$0xff]  ;;  %v138_v60 = vld [vmem:[%s4987_s0 + $0x320] sm:$0xff] }
  0x75   :  { %665 = vmatprep.mubr.f32.mxu1 %v93_v61  ;;  %v140_v61 = vld [vmem:[%s4987_s0 + $0x330] sm:$0xff] }
  0x77   :  { %433 = vmatmul.mubr.f32.gmra.mxu0 %v90_v62  ;;  %v2274_v62 = vld [vmem:[%s4988_s3 + $0x178] sm:$0xff] }
  0x78   :  { %666 = vmatmul.mubr.f32.gmra.mxu1 %v92_v63  ;;  %438 = vmatprep.mubr.f32.mxu0 %v95_v0  ;;  %v2273_v63 = vld [vmem:[%s4988_s3 + $0x170] sm:$0xff]  ;;  %v143_v0 = vld [vmem:[%s4987_s0 + $0x348] sm:$0xff] }
  0x79   :  { %671 = vmatprep.mubr.f32.mxu1 %v97_v1  ;;  %v145_v1 = vld [vmem:[%s4987_s0 + $0x358] sm:$0xff]  ;;  %935 = vmatprep.subr.mxu0 %v2274_v62 }
  0x7a   :  { %936 = vmatpush1.msra.mxu0 %v2273_v63 }
  0x7b   :  { %439 = vmatmul.mubr.f32.gmra.mxu0 %v94_v2  ;;  %v879_v2 = vld [vmem:[%s4988_s3 + $0xc8] sm:$0xff] }
  0x7c   :  { %672 = vmatmul.mubr.f32.gmra.mxu1 %v96_v3  ;;  %444 = vmatprep.mubr.f32.mxu0 %v99_v4  ;;  %v142_v3 = vld [vmem:[%s4987_s0 + $0x340] sm:$0xff]  ;;  %v144_v4 = vld [vmem:[%s4987_s0 + $0x350] sm:$0xff] }
  0x7d   :  { %677 = vmatprep.mubr.f32.mxu1 %v101_v5  ;;  %v878_v5 = vld [vmem:[%s4988_s3 + $0xc0] sm:$0xff]  ;;  %1050 = vmatprep.subr.mxu1 %v879_v2 }
  0x7e   :  { %1051 = vmatpush1.msra.mxu1 %v878_v5 }
  0x7f   :  { %445 = vmatmul.mubr.f32.gmra.mxu0 %v98_v6  ;;  %v147_v6 = vld [vmem:[%s4987_s0 + $0x368] sm:$0xff] }
  0x80   :  { %678 = vmatmul.mubr.f32.gmra.mxu1 %v100_v7  ;;  %450 = vmatprep.mubr.f32.mxu0 %v103_v8  ;;  %v149_v7 = vld [vmem:[%s4987_s0 + $0x378] sm:$0xff]  ;;  %v2272_v8 = vld [vmem:[%s4988_s3 + $0x168] sm:$0xff] }
  0x81   :  { %683 = vmatprep.mubr.f32.mxu1 %v105_v9  ;;  %v146_v9 = vld [vmem:[%s4987_s0 + $0x360] sm:$0xff]  ;;  %937 = vmatprep.subr.mxu0 %v2272_v8 }
  0x83   :  { %451 = vmatmul.mubr.f32.gmra.mxu0 %v102_v10  ;;  %v148_v10 = vld [vmem:[%s4987_s0 + $0x370] sm:$0xff] }
  0x84   :  { %684 = vmatmul.mubr.f32.gmra.mxu1 %v104_v11  ;;  %456 = vmatprep.mubr.f32.mxu0 %v107_v12  ;;  %v2271_v11 = vld [vmem:[%s4988_s3 + $0x160] sm:$0xff]  ;;  %v877_v12 = vld [vmem:[%s4988_s3 + $0xb8] sm:$0xff] }
  0x85   :  { %689 = vmatprep.mubr.f32.mxu1 %v109_v13  ;;  %938 = vmatpush1.msra.mxu0 %v2271_v11  ;;  %v876_v13 = vld [vmem:[%s4988_s3 + $0xb0] sm:$0xff] }
  0x86   :  { %1052 = vmatprep.subr.mxu1 %v877_v12 }
  0x87   :  { %457 = vmatmul.mubr.f32.gmra.mxu0 %v106_v14  ;;  %1053 = vmatpush1.msra.mxu1 %v876_v13  ;;  %v2270_v14 = vld [vmem:[%s4988_s3 + $0x158] sm:$0xff] }
  0x88   :  { %690 = vmatmul.mubr.f32.gmra.mxu1 %v108_v15  ;;  %462 = vmatprep.mubr.f32.mxu0 %v111_v16  ;;  %v2269_v15 = vld [vmem:[%s4988_s3 + $0x150] sm:$0xff]  ;;  %v875_v16 = vld [vmem:[%s4988_s3 + $0xa8] sm:$0xff] }
  0x89   :  { %695 = vmatprep.mubr.f32.mxu1 %v113_v17  ;;  %939 = vmatprep.subr.mxu0 %v2270_v14  ;;  %v874_v17 = vld [vmem:[%s4988_s3 + $0xa0] sm:$0xff] }
  0x8a   :  { %940 = vmatpush1.msra.mxu0 %v2269_v15  ;;  %1054 = vmatprep.subr.mxu1 %v875_v16 }
  0x8b   :  { %463 = vmatmul.mubr.f32.gmra.mxu0 %v110_v18  ;;  %1055 = vmatpush1.msra.mxu1 %v874_v17  ;;  %v2268_v18 = vld [vmem:[%s4988_s3 + $0x148] sm:$0xff] }
  0x8c   :  { %696 = vmatmul.mubr.f32.gmra.mxu1 %v112_v19  ;;  %468 = vmatprep.mubr.f32.mxu0 %v115_v22  ;;  %v2267_v19 = vld [vmem:[%s4988_s3 + $0x140] sm:$0xff]  ;;  %v2266_v22 = vld [vmem:[%s4988_s3 + $0x138] sm:$0xff] }
  0x8d   :  { %701 = vmatprep.mubr.f32.mxu1 %v117_v23  ;;  %941 = vmatprep.subr.mxu0 %v2268_v18  ;;  %v2265_v23 = vld [vmem:[%s4988_s3 + $0x130] sm:$0xff]  ;;  %v278_v18 = vld [vmem:[%s4989_s2] sm:$0x3] }
  0x8e   :  { %942 = vmatpush1.msra.mxu0 %v2267_v19  ;;  %1056 = vmatprep.subr.mxu1 %v873_v20 }
  0x8f   :  { %469 = vmatmul.mubr.f32.gmra.mxu0 %v114_v24  ;;  %1057 = vmatpush1.msra.mxu1 %v872_v21  ;;  %v871_v24 = vld [vmem:[%s4988_s3 + $0x88] sm:$0xff] }
  0x90   :  { %702 = vmatmul.mubr.f32.gmra.mxu1 %v116_v25  ;;  %474 = vmatprep.mubr.f32.mxu0 %v119_v26  ;;  %v870_v25 = vld [vmem:[%s4988_s3 + $0x80] sm:$0xff]  ;;  %v869_v26 = vld [vmem:[%s4988_s3 + $0x78] sm:$0xff] }
  0x91   :  { %707 = vmatprep.mubr.f32.mxu1 %v121_v27  ;;  %943 = vmatprep.subr.mxu0 %v2266_v22  ;;  %v868_v27 = vld [vmem:[%s4988_s3 + $0x70] sm:$0xff] }
  0x92   :  { %944 = vmatpush1.msra.mxu0 %v2265_v23  ;;  %1058 = vmatprep.subr.mxu1 %v871_v24 }
  0x93   :  { %475 = vmatmul.mubr.f32.gmra.mxu0 %v118_v29  ;;  %1059 = vmatpush1.msra.mxu1 %v870_v25  ;;  %v2264_v29 = vld [vmem:[%s4988_s3 + $0x128] sm:$0xff] }
  0x94   :  { %708 = vmatmul.mubr.f32.gmra.mxu1 %v120_v30  ;;  %480 = vmatprep.mubr.f32.mxu0 %v123_v32  ;;  %v866_v30 = vld [vmem:[%s4988_s3 + $0x60] sm:$0xff] }
  0x95   :  { %713 = vmatprep.mubr.f32.mxu1 %v125_v33  ;;  %1060 = vmatprep.subr.mxu1 %v869_v26  ;;  %v2263_v32 = vld [vmem:[%s4988_s3 + $0x120] sm:$0xff]  ;;  %v864_v33 = vld [vmem:[%s4988_s3 + $0x50] sm:$0xff] }
  0x96   :  { %1061 = vmatpush1.msra.mxu1 %v868_v27  ;;  %945 = vmatprep.subr.mxu0 %v2264_v29 }
  0x97   :  { %481 = vmatmul.mubr.f32.gmra.mxu0 %v122_v36  ;;  %1062 = vmatprep.subr.mxu1 %v867_v28  ;;  %v861_v36 = vld [vmem:[%s4988_s3 + $0x38] sm:$0xff] }
  0x98   :  { %714 = vmatmul.mubr.f32.gmra.mxu1 %v124_v37  ;;  %486 = vmatprep.mubr.f32.mxu0 %v127_v38  ;;  %v860_v37 = vld [vmem:[%s4988_s3 + $0x30] sm:$0xff]  ;;  %v859_v38 = vld [vmem:[%s4988_s3 + $0x28] sm:$0xff] }
  0x99   :  { %719 = vmatprep.mubr.f32.mxu1 %v129_v39  ;;  %1063 = vmatpush1.msra.mxu1 %v866_v30  ;;  %v2262_v39 = vld [vmem:[%s4988_s3 + $0x118] sm:$0xff] }
  0x9a   :  { %1064 = vmatprep.subr.mxu1 %v865_v31  ;;  %946 = vmatpush1.msra.mxu0 %v2263_v32 }
  0x9b   :  { %487 = vmatmul.mubr.f32.gmra.mxu0 %v126_v42  ;;  %1065 = vmatpush1.msra.mxu1 %v864_v33  ;;  %v857_v42 = vld [vmem:[%s4988_s3 + $0x18] sm:$0xff] }
  0x9c   :  { %720 = vmatmul.mubr.f32.gmra.mxu1 %v128_v43  ;;  %492 = vmatprep.mubr.f32.mxu0 %v131_v45  ;;  %v856_v43 = vld [vmem:[%s4988_s3 + $0x10] sm:$0xff]  ;;  %v854_v45 = vld [vmem:[%s4988_s3] sm:$0xff] }
  0x9d   :  { %725 = vmatprep.mubr.f32.mxu1 %v133_v46  ;;  %1066 = vmatprep.subr.mxu1 %v863_v34  ;;  %v4998_v46 = vmov 0.0  }
  0x9e   :  { %1067 = vmatpush1.msra.mxu1 %v862_v35  ;;  %947 = vmatprep.subr.mxu0 %v2262_v39 }
  0x9f   :  { %493 = vmatmul.mubr.f32.gmra.mxu0 %v130_v48  ;;  %1068 = vmatprep.subr.mxu1 %v861_v36  ;;  %v2259_v48 = vld [vmem:[%s4988_s3 + $0x100] sm:$0xff] }
  0xa0   :  { %726 = vmatmul.mubr.f32.gmra.mxu1 %v132_v49  ;;  %498 = vmatprep.mubr.f32.mxu0 %v135_v51  ;;  %v2354_v49 = vld [vmem:[%s4988_s3 + $0x3f8] sm:$0xff] }
  0xa1   :  { %731 = vmatprep.mubr.f32.mxu1 %v137_v52  ;;  %1069 = vmatpush1.msra.mxu1 %v860_v37 }
  0xa2   :  { %1070 = vmatprep.subr.mxu1 %v859_v38  ;;  %948 = vmatpush1.msra.mxu0 %v2261_v40 }
  0xa3   :  { %499 = vmatmul.mubr.f32.gmra.mxu0 %v134_v54  ;;  %1071 = vmatpush1.msra.mxu1 %v858_v41 }
  0xa4   :  { %732 = vmatmul.mubr.f32.gmra.mxu1 %v136_v55  ;;  %504 = vmatprep.mubr.f32.mxu0 %v139_v58 }
  0xa5   :  { %737 = vmatprep.mubr.f32.mxu1 %v141_v59  ;;  %1072 = vmatprep.subr.mxu1 %v857_v42 }
  0xa6   :  { %1073 = vmatpush1.msra.mxu1 %v856_v43  ;;  %949 = vmatprep.subr.mxu0 %v2260_v47 }
  0xa7   :  { %505 = vmatmul.mubr.f32.gmra.mxu0 %v138_v60  ;;  %1074 = vmatprep.subr.mxu1 %v855_v44 }
  0xa8   :  { %738 = vmatmul.mubr.f32.gmra.mxu1 %v140_v61  ;;  %510 = vmatprep.mubr.f32.mxu0 %v143_v0 }
  0xa9   :  { %743 = vmatprep.mubr.f32.mxu1 %v145_v1  ;;  %1075 = vmatpush1.msra.mxu1 %v854_v45 }
  0xaa   :  { %950 = vmatpush1.msra.mxu0 %v2259_v48  ;;  %1380 = vmatprep.subr.mxu1 %v2354_v49 }
  0xab   :  { %511 = vmatmul.mubr.f32.gmra.mxu0 %v142_v3  ;;  %1202 = vmatprep.subr.mxu0 %v2322_v50 }
  0xac   :  { %744 = vmatmul.mubr.f32.gmra.mxu1 %v144_v4  ;;  %516 = vmatprep.mubr.f32.mxu0 %v147_v6 }
  0xad   :  { %749 = vmatprep.mubr.f32.mxu1 %v149_v7  ;;  %v280_v7 = vlaneseq }
  0xaf   :  { %517 = vmatmul.mubr.f32.gmra.mxu0 %v146_v9  ;;  %v3798_v12 = vshrl.u32 %v280_v7, 7 }
  0xb0   :  { %750 = vmatmul.mubr.f32.gmra.mxu1 %v148_v10  ;;  %983 = vmatprep.mubr.f32.mxu0 %v4998_v46 }
  0xb1   :  { %1108 = vmatprep.mubr.f32.mxu1 %v4998_v46  ;;  %v5001_v17 = vsub.s32 0, %v3798_v12  ;;  %v5000_v26 = vsub.s32 1, %v3798_v12 }
  0xb3   :  { %v3822_v23 = vrot.slane %v278_v18, %v5001_v17  ;;  %v3834_v33 = vrot.slane %v278_v18, %v5000_v26 }
 0x103   :  { %v356_v51 = vpop.f32.mrf.mxu0 }
 0x104   :  { %v3754_v52 = vpop.f32.mrf.mxu1  ;;  %v357_v41 = vadd.f32 %v356_v51, %v3822_v23 }
 0x105   :  { %v358_v53 = vpop.f32.mrf.mxu0 }
 0x106   :  { %v3756_v54 = vpop.f32.mrf.mxu1  ;;  %v359_v49 = vadd.f32 %v358_v53, %v3834_v33  ;;  %v590_v18 = vadd.f32 %v3754_v52, %v357_v41 }
 0x107   :  { %v3758_v55 = vpop.f32.mrf.mxu0 }
 0x108   :  { %v3760_v56 = vpop.f32.mrf.mxu1 }
 0x109   :  { %v3762_v57 = vpop.f32.mrf.mxu0 }
 0x10a   :  { %v3764_v58 = vpop.f32.mrf.mxu1  ;;  %v365_v53 = vadd.f32 %v3762_v57, %v3834_v33 }
 0x10b   :  { %v3766_v59 = vpop.f32.mrf.mxu0 }
 0x10c   :  { %v3768_v60 = vpop.f32.mrf.mxu1  ;;  %v369_v57 = vadd.f32 %v3766_v59, %v3822_v23 }
 0x10d   :  { %v3770_v61 = vpop.f32.mrf.mxu0 }
 0x10e   :  { %v3772_v62 = vpop.f32.mrf.mxu1  ;;  %v602_v59 = vadd.f32 %v3768_v60, %v369_v57 }
 0x10f   :  { %v3774_v63 = vpop.f32.mrf.mxu0 }
 0x110   :  { %v3776_v0 = vpop.f32.mrf.mxu1 }
 0x111   :  { %v3778_v1 = vpop.f32.mrf.mxu0 }
 0x112   :  { %v3780_v2 = vpop.f32.mrf.mxu1 }
 0x113   :  { %v3782_v3 = vpop.f32.mrf.mxu0 }
 0x114   :  { %v3784_v4 = vpop.f32.mrf.mxu1 }
 0x115   :  { %v3786_v5 = vpop.f32.mrf.mxu0 }
 0x116   :  { %v3788_v6 = vpop.f32.mrf.mxu1 }
 0x117   :  { %v3790_v8 = vpop.f32.mrf.mxu0 }
 0x118   :  { %v3792_v9 = vpop.f32.mrf.mxu1 }
 0x119   :  { %v3794_v10 = vpop.f32.mrf.mxu0 }
 0x11a   :  { %v3796_v11 = vpop.f32.mrf.mxu1 }
 0x11b   :  { %v3800_v13 = vpop.f32.mrf.mxu0 }
 0x11c   :  { %v3802_v14 = vpop.f32.mrf.mxu1 }
 0x11d   :  { %v3804_v15 = vpop.f32.mrf.mxu0 }
 0x11e   :  { %v3806_v16 = vpop.f32.mrf.mxu1 }
 0x11f   :  { %v3812_v19 = vpop.f32.mrf.mxu0 }
 0x120   :  { %v3814_v20 = vpop.f32.mrf.mxu1 }
 0x121   :  { %v3816_v21 = vpop.f32.mrf.mxu0 }
 0x122   :  { %v3818_v22 = vpop.f32.mrf.mxu1 }
 0x123   :  { %v404_v24 = vpop.f32.mrf.mxu0 }
 0x124   :  { %v637_v25 = vpop.f32.mrf.mxu1  ;;  %v405_v27 = vadd.f32 %v404_v24, %v3822_v23  ;;  %v363_v24 = vadd.f32 %v3758_v55, %v3822_v23 }
 0x125   :  { %v3826_v28 = vpop.f32.mrf.mxu0 }
 0x126   :  { %v3828_v29 = vpop.f32.mrf.mxu1  ;;  %v3830_v30 = vadd.f32 %v637_v25, %v405_v27  ;;  %v596_v55 = vadd.f32 %v3760_v56, %v363_v24  ;;  %v371_v56 = vadd.f32 %v3770_v61, %v3834_v33  ;;  %v375_v61 = vadd.f32 %v3774_v63, %v3822_v23 }
 0x127   :  { %v410_v31 = vpop.f32.mrf.mxu0 }
 0x128   :  { %v643_v32 = vpop.f32.mrf.mxu1  ;;  %v411_v34 = vadd.f32 %v410_v31, %v3822_v23 }
 0x129   :  { %v412_v35 = vpop.f32.mrf.mxu0 }
 0x12a   :  { %v645_v36 = vpop.f32.mrf.mxu1  ;;  %v644_v37 = vadd.f32 %v643_v32, %v411_v34  ;;  %v413_v38 = vadd.f32 %v412_v35, %v3834_v33  ;;  %v592_v35 = vadd.f32 %v3756_v54, %v359_v49  ;;  %v598_v54 = vadd.f32 %v3764_v58, %v365_v53 }
 0x12b   :  { %v416_v39 = vpop.f32.mrf.mxu0 }
 0x12c   :  { %v649_v40 = vpop.f32.mrf.mxu1  ;;  %v646_v42 = vadd.f32 %v645_v36, %v413_v38  ;;  %v417_v43 = vadd.f32 %v416_v39, %v3822_v23  ;;  %2618 = vtanh.f32 %v644_v37 }
 0x12d   :  { %v418_v44 = vpop.f32.mrf.mxu0 }
 0x12e   :  { %v651_v45 = vpop.f32.mrf.mxu1  ;;  %2620 = vtanh.f32 %v646_v42  ;;  %v650_v47 = vadd.f32 %v649_v40, %v417_v43  ;;  %v419_v48 = vadd.f32 %v418_v44, %v3834_v33 }
 0x12f   :  { %v422_v50 = vpop.f32.mrf.mxu0 }
 0x130   :  { %v655_v7 = vpop.f32.mrf.mxu1  ;;  %v652_v51 = vadd.f32 %v651_v45, %v419_v48  ;;  %v423_v25 = vadd.f32 %v422_v50, %v3822_v23  ;;  %2622 = vtanh.f32 %v650_v47 }
 0x131   :  { %v424_v27 = vpop.f32.mrf.mxu0 }
 0x132   :  { %v657_v31 = vpop.f32.mrf.mxu1  ;;  %2624 = vtanh.f32 %v652_v51  ;;  %v656_v32 = vadd.f32 %v655_v7, %v423_v25  ;;  %v425_v34 = vadd.f32 %v424_v27, %v3834_v33  ;;  %v604_v25 = vadd.f32 %v3772_v62, %v371_v56 }
 0x133   :  { %v428_v36 = vpop.f32.mrf.mxu0  ;;  %2626 = vtanh.f32 %v590_v18  ;;  %v608_v62 = vadd.f32 %v3776_v0, %v375_v61  ;;  %v381_v56 = vadd.f32 %v3782_v3, %v3822_v23 }
 0x134   :  { %v661_v52 = vpop.f32.mrf.mxu1  ;;  %v658_v37 = vadd.f32 %v657_v31, %v425_v34  ;;  %v429_v38 = vadd.f32 %v428_v36, %v3822_v23  ;;  %2628 = vtanh.f32 %v656_v32 }
 0x135   :  { %v430_v39 = vpop.f32.mrf.mxu0 }
 0x136   :  { %v663_v40 = vpop.f32.mrf.mxu1  ;;  %2630 = vtanh.f32 %v658_v37  ;;  %v662_v41 = vadd.f32 %v661_v52, %v429_v38  ;;  %v431_v42 = vadd.f32 %v430_v39, %v3834_v33  ;;  %v377_v52 = vadd.f32 %v3778_v1, %v3834_v33 }
 0x137   :  { %2632 = vtanh.f32 %v592_v35  ;;  %v434_v43 = vpop.f32.mrf.mxu0 }
 0x138   :  { %v667_v44 = vpop.f32.mrf.mxu1  ;;  %2634 = vtanh.f32 %v596_v55  ;;  %v664_v45 = vadd.f32 %v663_v40, %v431_v42  ;;  %v435_v47 = vadd.f32 %v434_v43, %v3822_v23 }
 0x139   :  { %2636 = vtanh.f32 %v662_v41  ;;  %v436_v48 = vpop.f32.mrf.mxu0  ;;  %v3859_v50 = vpop.eup %2618 }
 0x13a   :  { %v669_v49 = vpop.f32.mrf.mxu1  ;;  %2638 = vtanh.f32 %v664_v45  ;;  %v668_v7 = vadd.f32 %v667_v44, %v435_v47  ;;  %v437_v58 = vadd.f32 %v436_v48, %v3834_v33  ;;  %v610_v44 = vadd.f32 %v3780_v2, %v377_v52 }
 0x13b   :  { %v3862_v18 = vpop.eup %2620  ;;  %2640 = vtanh.f32 %v598_v54  ;;  %v440_v24 = vpop.f32.mrf.mxu0 }
 0x13c   :  { %v673_v51 = vpop.f32.mrf.mxu1  ;;  %v670_v27 = vadd.f32 %v669_v49, %v437_v58  ;;  %v441_v31 = vadd.f32 %v440_v24, %v3822_v23  ;;  %v821_v32 = vmax.f32 %v3859_v50, %v3862_v18  ;;  %2642 = vtanh.f32 %v668_v7  ;;  %v2326_v50 = vld [vmem:[%s4988_s3 + $0x318] sm:$0xff]  ;;  %v2295_v18 = vld [vmem:[%s4988_s3 + $0x220] sm:$0xff] }
 0x13d   :  { %v442_v34 = vpop.f32.mrf.mxu0  ;;  %v3871_v53 = vpop.eup %2622  ;;  %v383_v49 = vadd.f32 %v3786_v5, %v3834_v33  ;;  %v614_v5 = vadd.f32 %v3784_v4, %v381_v56 }
 0x13e   :  { %v675_v35 = vpop.f32.mrf.mxu1  ;;  %2644 = vtanh.f32 %v670_v27  ;;  %v674_v60 = vadd.f32 %v673_v51, %v441_v31  ;;  %v443_v36 = vadd.f32 %v442_v34, %v3834_v33  ;;  %v387_v31 = vadd.f32 %v3790_v8, %v3822_v23 }
 0x13f   :  { %v3874_v63 = vpop.eup %2624  ;;  %2646 = vtanh.f32 %v602_v59  ;;  %v446_v55 = vpop.f32.mrf.mxu0 }
 0x140   :  { %v679_v37 = vpop.f32.mrf.mxu1  ;;  %2648 = vtanh.f32 %v604_v25  ;;  %v676_v38 = vadd.f32 %v675_v35, %v443_v36  ;;  %v447_v39 = vadd.f32 %v446_v55, %v3822_v23  ;;  %v822_v40 = vmax.f32 %v3871_v53, %v3874_v63  ;;  %v3882_v41 = vpop.eup %2626  ;;  %v2386_v53 = vld [vmem:[%s4988_s3 + $0x4f8] sm:$0xff] }
 0x141   :  { %2650 = vtanh.f32 %v674_v60  ;;  %v448_v42 = vpop.f32.mrf.mxu0  ;;  %v3884_v57 = vpop.eup %2628  ;;  %v616_v36 = vadd.f32 %v3788_v6, %v383_v49  ;;  %v620_v6 = vadd.f32 %v3792_v9, %v387_v31 }
 0x142   :  { %v681_v54 = vpop.f32.mrf.mxu1  ;;  %2652 = vtanh.f32 %v676_v38  ;;  %v680_v0 = vadd.f32 %v679_v37, %v447_v39  ;;  %v449_v1 = vadd.f32 %v448_v42, %v3834_v33 }
 0x143   :  { %v3887_v43 = vpop.eup %2630  ;;  %2654 = vtanh.f32 %v608_v62  ;;  %v452_v45 = vpop.f32.mrf.mxu0 }
 0x144   :  { %v685_v47 = vpop.f32.mrf.mxu1  ;;  %v3892_v48 = vpop.eup %2632  ;;  %v682_v7 = vadd.f32 %v681_v54, %v449_v1  ;;  %v453_v58 = vadd.f32 %v452_v45, %v3822_v23  ;;  %v823_v59 = vmax.f32 %v3884_v57, %v3887_v43  ;;  %2656 = vtanh.f32 %v680_v0  ;;  %v2359_v57 = vld [vmem:[%s4988_s3 + $0x420] sm:$0xff] }
 0x145   :  { %v3899_v61 = vpop.eup %2634  ;;  %v454_v2 = vpop.f32.mrf.mxu0  ;;  %v389_v54 = vadd.f32 %v3794_v10, %v3834_v33  ;;  %v812_v31 = vmax.f32 %v3882_v41, %v3892_v48  ;;  %v2353_v41 = vld [vmem:[%s4988_s3 + $0x3f0] sm:$0xff] }
 0x146   :  { %v687_v24 = vpop.f32.mrf.mxu1  ;;  %v3901_v51 = vpop.eup %2636  ;;  %2658 = vtanh.f32 %v682_v7  ;;  %v686_v3 = vadd.f32 %v685_v47, %v453_v58  ;;  %v455_v25 = vadd.f32 %v454_v2, %v3834_v33 }
 0x147   :  { %v3904_v27 = vpop.eup %2638  ;;  %2660 = vtanh.f32 %v610_v44  ;;  %v458_v34 = vpop.f32.mrf.mxu0 }
 0x148   :  { %v691_v35 = vpop.f32.mrf.mxu1  ;;  %v3909_v60 = vpop.eup %2640  ;;  %v688_v62 = vadd.f32 %v687_v24, %v455_v25  ;;  %v459_v52 = vadd.f32 %v458_v34, %v3822_v23  ;;  %v824_v55 = vmax.f32 %v3901_v51, %v3904_v27  ;;  %2662 = vtanh.f32 %v686_v3  ;;  %v2355_v51 = vld [vmem:[%s4988_s3 + $0x400] sm:$0xff] }
 0x149   :  { %v460_v37 = vpop.f32.mrf.mxu0  ;;  %v3915_v39 = vpop.eup %2642  ;;  %v622_v3 = vadd.f32 %v3796_v11, %v389_v54 }
 0x14a   :  { %v693_v38 = vpop.f32.mrf.mxu1  ;;  %2664 = vtanh.f32 %v688_v62  ;;  %v692_v4 = vadd.f32 %v691_v35, %v459_v52  ;;  %v461_v8 = vadd.f32 %v460_v37, %v3834_v33  ;;  %v395_v35 = vadd.f32 %v3804_v15, %v3834_v33 }
 0x14b   :  { %v3918_v42 = vpop.eup %2644  ;;  %2666 = vtanh.f32 %v614_v5  ;;  %v464_v0 = vpop.f32.mrf.mxu0  ;;  %v393_v15 = vadd.f32 %v3800_v13, %v3822_v23  ;;  %v2351_v13 = vld [vmem:[%s4988_s3 + $0x3e0] sm:$0xff] }
 0x14c   :  { %v697_v1 = vpop.f32.mrf.mxu1  ;;  %v3923_v44 = vpop.eup %2646  ;;  %2668 = vtanh.f32 %v616_v36  ;;  %v694_v56 = vadd.f32 %v693_v38, %v461_v8  ;;  %v465_v45 = vadd.f32 %v464_v0, %v3822_v23  ;;  %v825_v47 = vmax.f32 %v3915_v39, %v3918_v42  ;;  %v1784_v39 = vld [vmem:[%s4990_s5 + $0x70] sm:$0xff]  ;;  %v1799_v42 = vld [vmem:[%s4990_s5 + $0xe8] sm:$0xff] }
 0x14d   :  { %v3928_v49 = vpop.eup %2648  ;;  %2670 = vtanh.f32 %v692_v4  ;;  %v466_v7 = vpop.f32.mrf.mxu0 }
 0x14e   :  { %v699_v58 = vpop.f32.mrf.mxu1  ;;  %v2651_v9 = vpop.eup %2650  ;;  %2672 = vtanh.f32 %v694_v56  ;;  %v698_v2 = vadd.f32 %v697_v1, %v465_v45  ;;  %v467_v10 = vadd.f32 %v466_v7, %v3834_v33  ;;  %v813_v1 = vmax.f32 %v3899_v61, %v3909_v60  ;;  %v2352_v56 = vld [vmem:[%s4988_s3 + $0x3e8] sm:$0xff] }
 0x14f   :  { %v2653_v24 = vpop.eup %2652  ;;  %2674 = vtanh.f32 %v620_v6  ;;  %v470_v25 = vpop.f32.mrf.mxu0  ;;  %v628_v7 = vadd.f32 %v3806_v16, %v395_v35  ;;  %v401_v61 = vadd.f32 %v3816_v21, %v3834_v33  ;;  %v626_v21 = vadd.f32 %v3802_v14, %v393_v15  ;;  %v2319_v14 = vld [vmem:[%s4988_s3 + $0x2e0] sm:$0xff] }
 0x150   :  { %v703_v5 = vpop.f32.mrf.mxu1  ;;  %v3934_v34 = vpop.eup %2654  ;;  %v700_v36 = vadd.f32 %v699_v58, %v467_v10  ;;  %v471_v62 = vadd.f32 %v470_v25, %v3822_v23  ;;  %v826_v52 = vmax.f32 %v2651_v9, %v2653_v24  ;;  %2676 = vtanh.f32 %v698_v2 }
 0x151   :  { %v472_v37 = vpop.f32.mrf.mxu0  ;;  %v2657_v4 = vpop.eup %2656 }
 0x152   :  { %v705_v38 = vpop.f32.mrf.mxu1  ;;  %2678 = vtanh.f32 %v700_v36  ;;  %v704_v11 = vadd.f32 %v703_v5, %v471_v62  ;;  %v473_v8 = vadd.f32 %v472_v37, %v3834_v33  ;;  %v840_v6 = vmax.f32 %v812_v31, %v826_v52  ;;  %v2321_v5 = vld [vmem:[%s4988_s3 + $0x2f0] sm:$0xff]  ;;  %v2320_v62 = vld [vmem:[%s4988_s3 + $0x2e8] sm:$0xff] }
 0x153   :  { %v2659_v48 = vpop.eup %2658  ;;  %2680 = vtanh.f32 %v622_v3  ;;  %v476_v54 = vpop.f32.mrf.mxu0  ;;  %v814_v52 = vmax.f32 %v3923_v44, %v3928_v49  ;;  %v399_v44 = vadd.f32 %v3812_v19, %v3822_v23  ;;  %v634_v49 = vadd.f32 %v3818_v22, %v401_v61  ;;  %v2318_v19 = vld [vmem:[%s4988_s3 + $0x2d8] sm:$0xff] }
 0x154   :  { %v709_v0 = vpop.f32.mrf.mxu1  ;;  %v3950_v45 = vpop.eup %2660  ;;  %v706_v58 = vadd.f32 %v705_v38, %v473_v8  ;;  %v477_v9 = vadd.f32 %v476_v54, %v3822_v23  ;;  %1109 = vmatmul.mubr.f32.vlgmr.msra.gmra.mxu1 %v840_v6  ;;  %v827_v2 = vmax.f32 %v2657_v4, %v2659_v48  ;;  %2682 = vtanh.f32 %v704_v11  ;;  %v2350_v8 = vld [vmem:[%s4988_s3 + $0x3d8] sm:$0xff] }
 0x155   :  { %v478_v60 = vpop.f32.mrf.mxu0  ;;  %1114 = vmatprep.mubr.f32.mxu1 %v4998_v46  ;;  %1381 = vmatpush1.msra.mxu1 %v2353_v41  ;;  %v2663_v24 = vpop.eup %2662  ;;  %v815_v61 = vmax.f32 %v3934_v34, %v3950_v45  ;;  %v2348_v45 = vld [vmem:[%s4988_s3 + $0x3c8] sm:$0xff] }
 0x156   :  { %v711_v10 = vpop.f32.mrf.mxu1  ;;  %2684 = vtanh.f32 %v706_v58  ;;  %v710_v16 = vadd.f32 %v709_v0, %v477_v9  ;;  %v479_v3 = vadd.f32 %v478_v60, %v3834_v33  ;;  %v841_v25 = vmax.f32 %v813_v1, %v827_v2  ;;  %1382 = vmatprep.subr.mxu1 %v2352_v56  ;;  %v2317_v9 = vld [vmem:[%s4988_s3 + $0x2d0] sm:$0xff] }
 0x157   :  { %v2665_v31 = vpop.eup %2664  ;;  %v482_v35 = vpop.f32.mrf.mxu0  ;;  %1383 = vmatpush1.msra.mxu1 %v2351_v13  ;;  %2686 = vtanh.f32 %v628_v7  ;;  %v407_v1 = vadd.f32 %v3826_v28, %v3834_v33  ;;  %v2316_v28 = vld [vmem:[%s4988_s3 + $0x2c8] sm:$0xff] }
 0x158   :  { %v715_v36 = vpop.f32.mrf.mxu1  ;;  %v3970_v37 = vpop.eup %2666  ;;  %v712_v38 = vadd.f32 %v711_v10, %v479_v3  ;;  %v483_v4 = vadd.f32 %v482_v35, %v3822_v23  ;;  %984 = vmatmul.mubr.f32.vlgmr.msra.gmra.mxu0 %v841_v25  ;;  %1115 = vmatmul.mubr.f32.gmra.mxu1 %v841_v25  ;;  %v828_v11 = vmax.f32 %v2663_v24, %v2665_v31  ;;  %2688 = vtanh.f32 %v710_v16  ;;  %v2349_v10 = vld [vmem:[%s4988_s3 + $0x3d0] sm:$0xff] }
 0x159   :  { %v3979_v6 = vpop.eup %2668  ;;  %1203 = vmatpush1.msra.mxu0 %v2321_v5  ;;  %v484_v41 = vpop.f32.mrf.mxu0  ;;  %989 = vmatprep.mubr.f32.mxu0 %v4998_v46  ;;  %v632_v24 = vadd.f32 %v3814_v20, %v399_v44  ;;  %v2315_v20 = vld [vmem:[%s4988_s3 + $0x2c0] sm:$0xff]  ;;  %v640_v35 = vadd.f32 %v3828_v29, %v407_v1  ;;  %v2346_v1 = vld [vmem:[%s4988_s3 + $0x3b8] sm:$0xff] }
 0x15a   :  { %v717_v48 = vpop.f32.mrf.mxu1  ;;  %v2671_v15 = vpop.eup %2670  ;;  %2690 = vtanh.f32 %v712_v38  ;;  %v485_v54 = vadd.f32 %v484_v41, %v3834_v33  ;;  %1204 = vmatprep.subr.mxu0 %v2320_v62  ;;  %1120 = vmatprep.mubr.f32.mxu1 %v4998_v46  ;;  %v3987_v0 = vmax.f32 %v814_v52, %v828_v11  ;;  %v716_v56 = vadd.f32 %v715_v36, %v483_v4  ;;  %v2314_v52 = vld [vmem:[%s4988_s3 + $0x2b8] sm:$0xff]  ;;  %v2347_v41 = vld [vmem:[%s4988_s3 + $0x3c0] sm:$0xff] }
 0x15b   :  { %v2673_v22 = vpop.eup %2672  ;;  %v488_v7 = vpop.f32.mrf.mxu0  ;;  %1205 = vmatpush1.msra.mxu0 %v2319_v14  ;;  %1384 = vmatprep.subr.mxu1 %v2350_v8  ;;  %2692 = vtanh.f32 %v626_v21  ;;  %v2313_v14 = vld [vmem:[%s4988_s3 + $0x2b0] sm:$0xff]  ;;  %v816_v29 = vmax.f32 %v3970_v37, %v3979_v6  ;;  %v2312_v6 = vld [vmem:[%s4988_s3 + $0x2a8] sm:$0xff] }
 0x15c   :  { %v721_v58 = vpop.f32.mrf.mxu1  ;;  %v3997_v2 = vpop.eup %2674  ;;  %v718_v13 = vadd.f32 %v717_v48, %v485_v54  ;;  %990 = vmatmul.mubr.f32.gmra.mxu0 %v3987_v0  ;;  %1121 = vmatmul.mubr.f32.gmra.mxu1 %v3987_v0  ;;  %v829_v60 = vmax.f32 %v2671_v15, %v2673_v22  ;;  %2694 = vtanh.f32 %v634_v49  ;;  %v489_v16 = vadd.f32 %v488_v7, %v3822_v23 }
 0x15d   :  { %1206 = vmatprep.subr.mxu0 %v2318_v19  ;;  %v490_v3 = vpop.f32.mrf.mxu0  ;;  %995 = vmatprep.mubr.f32.mxu0 %v4998_v46  ;;  %v2677_v5 = vpop.eup %2676 }
 0x15e   :  { %v723_v25 = vpop.f32.mrf.mxu1  ;;  %2696 = vtanh.f32 %v718_v13  ;;  %v491_v31 = vadd.f32 %v490_v3, %v3834_v33  ;;  %1207 = vmatpush1.msra.mxu0 %v2317_v9  ;;  %1126 = vmatprep.mubr.f32.mxu1 %v4998_v46  ;;  %v4014_v34 = vmax.f32 %v815_v61, %v829_v60  ;;  %v722_v8 = vadd.f32 %v721_v58, %v489_v16  ;;  %v2345_v58 = vld [vmem:[%s4988_s3 + $0x3b0] sm:$0xff]  ;;  %v2310_v9 = vld [vmem:[%s4988_s3 + $0x298] sm:$0xff] }
 0x15f   :  { %v2679_v21 = vpop.eup %2678  ;;  %2698 = vtanh.f32 %v716_v56  ;;  %v494_v36 = vpop.f32.mrf.mxu0  ;;  %1208 = vmatprep.subr.mxu0 %v2316_v28  ;;  %1385 = vmatpush1.msra.mxu1 %v2349_v10  ;;  %v2311_v56 = vld [vmem:[%s4988_s3 + $0x2a0] sm:$0xff] }
 0x160   :  { %v727_v62 = vpop.f32.mrf.mxu1  ;;  %v2681_v38 = vpop.eup %2680  ;;  %v724_v4 = vadd.f32 %v723_v25, %v491_v31  ;;  %996 = vmatmul.mubr.f32.gmra.mxu0 %v4014_v34  ;;  %1127 = vmatmul.mubr.f32.gmra.mxu1 %v4014_v34  ;;  %v830_v11 = vmax.f32 %v2677_v5, %v2679_v21  ;;  %2700 = vtanh.f32 %v632_v24  ;;  %v495_v15 = vadd.f32 %v494_v36, %v3822_v23  ;;  %v2344_v24 = vld [vmem:[%s4988_s3 + $0x3a8] sm:$0xff]  ;;  %v2342_v21 = vld [vmem:[%s4988_s3 + $0x398] sm:$0xff] }
 0x161   :  { %1209 = vmatpush1.msra.mxu0 %v2315_v20  ;;  %v496_v44 = vpop.f32.mrf.mxu0  ;;  %1386 = vmatprep.subr.mxu1 %v2348_v45  ;;  %v2683_v48 = vpop.eup %2682  ;;  %v817_v13 = vmax.f32 %v3997_v2, %v2681_v38  ;;  %v2309_v2 = vld [vmem:[%s4988_s3 + $0x290] sm:$0xff]  ;;  %v2343_v20 = vld [vmem:[%s4988_s3 + $0x3a0] sm:$0xff] }
 0x162   :  { %v729_v49 = vpop.f32.mrf.mxu1  ;;  %v497_v54 = vadd.f32 %v496_v44, %v3834_v33  ;;  %1210 = vmatprep.subr.mxu0 %v2314_v52  ;;  %1001 = vmatprep.mubr.f32.mxu0 %v4998_v46  ;;  %v4039_v37 = vmax.f32 %v816_v29, %v830_v11  ;;  %2702 = vtanh.f32 %v724_v4  ;;  %v728_v3 = vadd.f32 %v727_v62, %v495_v15  ;;  %v2341_v52 = vld [vmem:[%s4988_s3 + $0x390] sm:$0xff]  ;;  %v2340_v29 = vld [vmem:[%s4988_s3 + $0x388] sm:$0xff] }
 0x163   :  { %v2685_v19 = vpop.eup %2684  ;;  %1211 = vmatpush1.msra.mxu0 %v2313_v14  ;;  %v500_v22 = vpop.f32.mrf.mxu0  ;;  %1132 = vmatprep.mubr.f32.mxu1 %v4998_v46  ;;  %2704 = vtanh.f32 %v640_v35  ;;  %v2307_v14 = vld [vmem:[%s4988_s3 + $0x280] sm:$0xff] }
 0x164   :  { %v730_v7 = vadd.f32 %v729_v49, %v497_v54  ;;  %1387 = vmatpush1.msra.mxu1 %v2347_v41  ;;  %1002 = vmatmul.mubr.f32.gmra.mxu0 %v4039_v37  ;;  %v831_v28 = vmax.f32 %v2683_v48, %v2685_v19  ;;  %v2687_v61 = vpop.eup %2686  ;;  %2706 = vtanh.f32 %v722_v8  ;;  %v733_v60 = vpop.f32.mrf.mxu1  ;;  %v501_v45 = vadd.f32 %v500_v22, %v3822_v23  ;;  %v2306_v41 = vld [vmem:[%s4988_s3 + $0x278] sm:$0xff]  ;;  %v2339_v48 = vld [vmem:[%s4988_s3 + $0x380] sm:$0xff]  ;;  %v2305_v19 = vld [vmem:[%s4988_s3 + $0x270] sm:$0xff] }
 0x165   :  { %1133 = vmatmul.mubr.f32.gmra.mxu1 %v4039_v37  ;;  %1212 = vmatprep.subr.mxu0 %v2312_v6  ;;  %v502_v10 = vpop.f32.mrf.mxu0  ;;  %v2689_v16 = vpop.eup %2688  ;;  %2708 = vtanh.f32 %v3830_v30  ;;  %v2308_v30 = vld [vmem:[%s4988_s3 + $0x288] sm:$0xff]  ;;  %v2338_v22 = vld [vmem:[%s4988_s3 + $0x378] sm:$0xff] }
 0x166   :  { %1388 = vmatprep.subr.mxu1 %v2346_v1  ;;  %v503_v25 = vadd.f32 %v502_v10, %v3834_v33  ;;  %1213 = vmatpush1.msra.mxu0 %v2311_v56  ;;  %v4067_v5 = vmax.f32 %v817_v13, %v831_v28  ;;  %2710 = vtanh.f32 %v730_v7  ;;  %v735_v62 = vpop.f32.mrf.mxu1  ;;  %v734_v49 = vadd.f32 %v733_v60, %v501_v45  ;;  %v2337_v1 = vld [vmem:[%s4988_s3 + $0x370] sm:$0xff]  ;;  %v2304_v56 = vld [vmem:[%s4988_s3 + $0x268] sm:$0xff]  ;;  %v2303_v28 = vld [vmem:[%s4988_s3 + $0x260] sm:$0xff] }
 0x167   :  { %v2691_v31 = vpop.eup %2690  ;;  %1389 = vmatpush1.msra.mxu1 %v2345_v58  ;;  %1214 = vmatprep.subr.mxu0 %v2310_v9  ;;  %2712 = vtanh.f32 %v728_v3  ;;  %v2336_v9 = vld [vmem:[%s4988_s3 + $0x368] sm:$0xff]  ;;  %v2335_v10 = vld [vmem:[%s4988_s3 + $0x360] sm:$0xff] }
 0x168   :  { %1390 = vmatprep.subr.mxu1 %v2344_v24  ;;  %1007 = vmatprep.mubr.f32.mxu0 %v4998_v46  ;;  %v832_v35 = vmax.f32 %v2689_v16, %v2691_v31  ;;  %v2693_v36 = vpop.eup %2692  ;;  %v736_v4 = vadd.f32 %v735_v62, %v503_v25  ;;  %v2302_v24 = vld [vmem:[%s4988_s3 + $0x258] sm:$0xff]  ;;  %v2331_v62 = vld [vmem:[%s4988_s3 + $0x340] sm:$0xff] }
 0x169   :  { %1138 = vmatprep.mubr.f32.mxu1 %v4998_v46  ;;  %1215 = vmatpush1.msra.mxu0 %v2309_v2  ;;  %v2695_v38 = vpop.eup %2694  ;;  %v818_v11 = vmax.f32 %v2693_v36, %v2687_v61  ;;  %v2334_v25 = vld [vmem:[%s4988_s3 + $0x358] sm:$0xff]  ;;  %v2301_v2 = vld [vmem:[%s4988_s3 + $0x250] sm:$0xff]  ;;  %v2300_v36 = vld [vmem:[%s4988_s3 + $0x248] sm:$0xff] }
 0x16a   :  { %1391 = vmatpush1.msra.mxu1 %v2343_v20  ;;  %1008 = vmatmul.mubr.f32.gmra.mxu0 %v4067_v5  ;;  %2714 = vtanh.f32 %v736_v4  ;;  %v2333_v20 = vld [vmem:[%s4988_s3 + $0x350] sm:$0xff]  ;;  %v2330_v4 = vld [vmem:[%s4988_s3 + $0x338] sm:$0xff] }
 0x16b   :  { %v2697_v8 = vpop.eup %2696  ;;  %1139 = vmatmul.mubr.f32.gmra.mxu1 %v4067_v5  ;;  %1392 = vmatprep.subr.mxu1 %v2342_v21  ;;  %v4099_v15 = vmax.f32 %v818_v11, %v832_v35  ;;  %2716 = vtanh.f32 %v734_v49  ;;  %v2332_v21 = vld [vmem:[%s4988_s3 + $0x348] sm:$0xff] }
 0x16c   :  { %v2699_v44 = vpop.eup %2698  ;;  %1216 = vmatprep.subr.mxu0 %v2308_v30  ;;  %1393 = vmatpush1.msra.mxu1 %v2341_v52 }
 0x16d   :  { %1217 = vmatpush1.msra.mxu0 %v2307_v14  ;;  %1394 = vmatprep.subr.mxu1 %v2340_v29  ;;  %v833_v54 = vmax.f32 %v2699_v44, %v2697_v8  ;;  %v2701_v6 = vpop.eup %2700  ;;  %v2298_v14 = vld [vmem:[%s4988_s3 + $0x238] sm:$0xff]  ;;  %v2329_v29 = vld [vmem:[%s4988_s3 + $0x330] sm:$0xff]  ;;  %v2328_v44 = vld [vmem:[%s4988_s3 + $0x328] sm:$0xff] }
 0x16e   :  { %1013 = vmatprep.mubr.f32.mxu0 %v4998_v46  ;;  %1144 = vmatprep.mubr.f32.mxu1 %v4998_v46  ;;  %v819_v7 = vmax.f32 %v2701_v6, %v2695_v38  ;;  %v2299_v38 = vld [vmem:[%s4988_s3 + $0x240] sm:$0xff]  ;;  %v2297_v8 = vld [vmem:[%s4988_s3 + $0x230] sm:$0xff]  ;;  %v2296_v6 = vld [vmem:[%s4988_s3 + $0x228] sm:$0xff] }
 0x16f   :  { %1218 = vmatprep.subr.mxu0 %v2306_v41  ;;  %1395 = vmatpush1.msra.mxu1 %v2339_v48  ;;  %v2703_v58 = vpop.eup %2702  ;;  %v2327_v48 = vld [vmem:[%s4988_s3 + $0x320] sm:$0xff] }
 0x170   :  { %1014 = vmatmul.mubr.f32.gmra.mxu0 %v4099_v15  ;;  %1145 = vmatmul.mubr.f32.gmra.mxu1 %v4099_v15  ;;  %v2705_v13 = vpop.eup %2704  ;;  %v4123_v61 = vmax.f32 %v819_v7, %v833_v54  ;;  %v506_v54 = vpop.f32.mrf.mxu0 }
 0x171   :  { %1219 = vmatpush1.msra.mxu0 %v2305_v19  ;;  %1396 = vmatprep.subr.mxu1 %v2338_v22  ;;  %v2707_v60 = vpop.eup %2706  ;;  %v2294_v22 = vld [vmem:[%s4988_s3 + $0x218] sm:$0xff]  ;;  %v739_v7 = vpop.f32.mrf.mxu1  ;;  %v507_v63 = vadd.f32 %v506_v54, %v3822_v23  ;;  %v2371_v54 = vld [vmem:[%s4988_s3 + $0x480] sm:$0xff] }
 0x172   :  { %1397 = vmatpush1.msra.mxu1 %v2337_v1  ;;  %1220 = vmatprep.subr.mxu0 %v2304_v56  ;;  %v834_v16 = vmax.f32 %v2707_v60, %v2703_v58  ;;  %v2709_v3 = vpop.eup %2708  ;;  %v2324_v1 = vld [vmem:[%s4988_s3 + $0x308] sm:$0xff]  ;;  %v508_v56 = vpop.f32.mrf.mxu0  ;;  %v2293_v58 = vld [vmem:[%s4988_s3 + $0x210] sm:$0xff]  ;;  %v2291_v60 = vld [vmem:[%s4988_s3 + $0x200] sm:$0xff] }
 0x173   :  { %1398 = vmatprep.subr.mxu1 %v2336_v9  ;;  %1019 = vmatprep.mubr.f32.mxu0 %v4998_v46  ;;  %v2711_v31 = vpop.eup %2710  ;;  %v820_v45 = vmax.f32 %v2709_v3, %v2705_v13  ;;  %v2323_v9 = vld [vmem:[%s4988_s3 + $0x300] sm:$0xff]  ;;  %v2384_v3 = vld [vmem:[%s4988_s3 + $0x4e8] sm:$0xff] }
 0x174   :  { %1150 = vmatprep.mubr.f32.mxu1 %v4998_v46  ;;  %1221 = vmatpush1.msra.mxu0 %v2303_v28  ;;  %v2713_v35 = vpop.eup %2712  ;;  %v2292_v28 = vld [vmem:[%s4988_s3 + $0x208] sm:$0xff] }
 0x175   :  { %1399 = vmatpush1.msra.mxu1 %v2335_v10  ;;  %1020 = vmatmul.mubr.f32.gmra.mxu0 %v4123_v61  ;;  %v4153_v30 = vmax.f32 %v820_v45, %v834_v16  ;;  %v835_v52 = vmax.f32 %v2713_v35, %v2711_v31  ;;  %v512_v10 = vpop.f32.mrf.mxu0  ;;  %v509_v16 = vadd.f32 %v508_v56, %v3834_v33  ;;  %v2383_v31 = vld [vmem:[%s4988_s3 + $0x4e0] sm:$0xff]  ;;  %v2365_v56 = vld [vmem:[%s4988_s3 + $0x450] sm:$0xff] }
 0x176   :  { %1151 = vmatmul.mubr.f32.gmra.mxu1 %v4123_v61  ;;  %1222 = vmatprep.subr.mxu0 %v2302_v24  ;;  %v741_v24 = vpop.f32.mrf.mxu1  ;;  %v740_v45 = vadd.f32 %v739_v7, %v507_v63  ;;  %v2361_v63 = vld [vmem:[%s4988_s3 + $0x430] sm:$0xff] }
 0x177   :  { %1400 = vmatprep.subr.mxu1 %v2334_v25  ;;  %1223 = vmatpush1.msra.mxu0 %v2301_v2  ;;  %v2715_v11 = vpop.eup %2714  ;;  %v4180_v49 = vmax.f32 %v821_v32, %v835_v52  ;;  %v2325_v32 = vld [vmem:[%s4988_s3 + $0x310] sm:$0xff]  ;;  %v514_v25 = vpop.f32.mrf.mxu0  ;;  %v742_v35 = vadd.f32 %v741_v24, %v509_v16  ;;  %v2380_v52 = vld [vmem:[%s4988_s3 + $0x4c8] sm:$0xff]  ;;  %v2362_v24 = vld [vmem:[%s4988_s3 + $0x438] sm:$0xff] }
 0x178   :  { %1401 = vmatpush1.msra.mxu1 %v2333_v20  ;;  %1025 = vmatprep.mubr.f32.mxu0 %v4998_v46  ;;  %v2717_v41 = vpop.eup %2716  ;;  %v745_v2 = vpop.f32.mrf.mxu1  ;;  %v2382_v20 = vld [vmem:[%s4988_s3 + $0x4d8] sm:$0xff]  ;;  %2718 = vtanh.f32 %v740_v45  ;;  %v2357_v16 = vld [vmem:[%s4988_s3 + $0x410] sm:$0xff] }
 0x179   :  { %1402 = vmatprep.subr.mxu1 %v2332_v21  ;;  %1156 = vmatprep.mubr.f32.mxu1 %v4998_v46  ;;  %v836_v19 = vmax.f32 %v2717_v41, %v2715_v11  ;;  %v513_v21 = vadd.f32 %v512_v10, %v3822_v23  ;;  %2720 = vtanh.f32 %v742_v35  ;;  %v2376_v11 = vld [vmem:[%s4988_s3 + $0x4a8] sm:$0xff]  ;;  %v2373_v41 = vld [vmem:[%s4988_s3 + $0x490] sm:$0xff]  ;;  %v518_v27 = vpop.f32.mrf.mxu0  ;;  %v1781_v35 = vld [vmem:[%s4990_s5 + $0x58] sm:$0xff] }
 0x17a   :  { %1224 = vmatprep.subr.mxu0 %v2300_v36  ;;  %1403 = vmatpush1.msra.mxu1 %v2331_v62  ;;  %v515_v36 = vadd.f32 %v514_v25, %v3834_v33  ;;  %v747_v62 = vpop.f32.mrf.mxu1 }
 0x17b   :  { %1026 = vmatmul.mubr.f32.gmra.mxu0 %v4153_v30  ;;  %1157 = vmatmul.mubr.f32.gmra.mxu1 %v4153_v30  ;;  %v4216_v13 = vmax.f32 %v822_v40, %v836_v19  ;;  %v2385_v40 = vld [vmem:[%s4988_s3 + $0x4f0] sm:$0xff] }
 0x17c   :  { %1225 = vmatpush1.msra.mxu0 %v2299_v38  ;;  %1404 = vmatprep.subr.mxu1 %v2330_v4  ;;  %v746_v38 = vadd.f32 %v745_v2, %v513_v21  ;;  %v2379_v4 = vld [vmem:[%s4988_s3 + $0x4c0] sm:$0xff]  ;;  %v2369_v19 = vld [vmem:[%s4988_s3 + $0x470] sm:$0xff]  ;;  %v751_v25 = vpop.f32.mrf.mxu1  ;;  %v519_v2 = vadd.f32 %v518_v27, %v3822_v23 }
 0x17d   :  { %1226 = vmatprep.subr.mxu0 %v2298_v14  ;;  %1405 = vmatpush1.msra.mxu1 %v2329_v29  ;;  %v2378_v14 = vld [vmem:[%s4988_s3 + $0x4b8] sm:$0xff]  ;;  %v2377_v29 = vld [vmem:[%s4988_s3 + $0x4b0] sm:$0xff] }
 0x17e   :  { %1227 = vmatpush1.msra.mxu0 %v2297_v8  ;;  %1406 = vmatprep.subr.mxu1 %v2328_v44  ;;  %2722 = vtanh.f32 %v746_v38  ;;  %v2375_v8 = vld [vmem:[%s4988_s3 + $0x4a0] sm:$0xff]  ;;  %v2374_v44 = vld [vmem:[%s4988_s3 + $0x498] sm:$0xff]  ;;  %v752_v45 = vadd.f32 %v751_v25, %v519_v2  ;;  %v1779_v38 = vld [vmem:[%s4990_s5 + $0x48] sm:$0xff] }
 0x17f   :  { %1031 = vmatprep.mubr.f32.mxu0 %v4998_v46  ;;  %1162 = vmatprep.mubr.f32.mxu1 %v4998_v46  ;;  %v1842_v25 = vld [vmem:[%s4990_s5 + $0x240] sm:$0xff] }
 0x180   :  { %1407 = vmatpush1.msra.mxu1 %v2327_v48  ;;  %1032 = vmatmul.mubr.f32.gmra.mxu0 %v4180_v49  ;;  %v2372_v48 = vld [vmem:[%s4988_s3 + $0x488] sm:$0xff] }
 0x181   :  { %1163 = vmatmul.mubr.f32.gmra.mxu1 %v4180_v49  ;;  %1228 = vmatprep.subr.mxu0 %v2296_v6  ;;  %v2370_v6 = vld [vmem:[%s4988_s3 + $0x478] sm:$0xff] }
 0x182   :  { %1408 = vmatprep.subr.mxu1 %v2326_v50  ;;  %1229 = vmatpush1.msra.mxu0 %v2295_v18  ;;  %v2368_v18 = vld [vmem:[%s4988_s3 + $0x468] sm:$0xff] }
 0x183   :  { %1409 = vmatpush1.msra.mxu1 %v2325_v32  ;;  %1230 = vmatprep.subr.mxu0 %v2294_v22  ;;  %v2367_v22 = vld [vmem:[%s4988_s3 + $0x460] sm:$0xff] }
 0x184   :  { %1410 = vmatprep.subr.mxu1 %v2324_v1  ;;  %1037 = vmatprep.mubr.f32.mxu0 %v4998_v46  ;;  %v2366_v1 = vld [vmem:[%s4988_s3 + $0x458] sm:$0xff] }
 0x185   :  { %1231 = vmatpush1.msra.mxu0 %v2293_v58  ;;  %1411 = vmatpush1.msra.mxu1 %v2323_v9  ;;  %v2719_v50 = vpop.eup %2718 }
 0x186   :  { %1444 = vmatprep.mubr.f32.mxu1 %v4998_v46  ;;  %1038 = vmatmul.mubr.f32.gmra.mxu0 %v4216_v13  ;;  %v2721_v32 = vpop.eup %2720 }
 0x187   :  { %1445 = vmatmul.mubr.f32.vlgmr.msra.gmra.mxu1 %v4014_v34  ;;  %1232 = vmatprep.subr.mxu0 %v2292_v28  ;;  %v837_v58 = vmax.f32 %v2719_v50, %v2721_v32  ;;  %v2364_v28 = vld [vmem:[%s4988_s3 + $0x448] sm:$0xff]  ;;  %v1849_v50 = vld [vmem:[%s4990_s5 + $0x278] sm:$0xff]  ;;  %v1772_v32 = vld [vmem:[%s4990_s5 + $0x10] sm:$0xff] }
 0x188   :  { %1233 = vmatpush1.msra.mxu0 %v2291_v60  ;;  %1266 = vmatprep.mubr.f32.mxu0 %v4998_v46  ;;  %v2363_v60 = vld [vmem:[%s4988_s3 + $0x440] sm:$0xff] }
 0x189   :  { %1450 = vmatprep.mubr.f32.mxu1 %v4998_v46  ;;  %1558 = vmatprep.subr.mxu0 %v2386_v53  ;;  %v851_v10 = vmax.f32 %v823_v59, %v837_v58  ;;  %v2358_v59 = vld [vmem:[%s4988_s3 + $0x418] sm:$0xff]  ;;  %v1847_v58 = vld [vmem:[%s4990_s5 + $0x268] sm:$0xff] }
 0x18a   :  { %1267 = vmatmul.mubr.f32.vlgmr.msra.gmra.mxu0 %v3987_v0  ;;  %v2381_v0 = vld [vmem:[%s4988_s3 + $0x4d0] sm:$0xff] }
 0x18b   :  { %1451 = vmatmul.mubr.f32.gmra.mxu1 %v4039_v37  ;;  %1559 = vmatpush1.msra.mxu0 %v2385_v40  ;;  %v2723_v7 = vpop.eup %2722  ;;  %v2360_v40 = vld [vmem:[%s4988_s3 + $0x428] sm:$0xff] }
 0x18c   :  { %1560 = vmatprep.subr.mxu0 %v2384_v3  ;;  %1272 = vmatprep.mubr.f32.mxu0 %v4998_v46  ;;  %v2356_v3 = vld [vmem:[%s4988_s3 + $0x408] sm:$0xff] }
 0x18d   :  { %1456 = vmatprep.mubr.f32.mxu1 %v4998_v46  ;;  %1561 = vmatpush1.msra.mxu0 %v2383_v31 }
 0x18e   :  { %1273 = vmatmul.mubr.f32.gmra.mxu0 %v4014_v34  ;;  %1562 = vmatprep.subr.mxu0 %v2382_v20  ;;  %v748_v34 = vadd.f32 %v747_v62, %v515_v36  ;;  %v753_v20 = vpop.f32.mrf.mxu1  ;;  %v1796_v36 = vld [vmem:[%s4990_s5 + $0xd0] sm:$0xff] }
 0x18f   :  { %1457 = vmatmul.mubr.f32.gmra.mxu1 %v4067_v5  ;;  %1563 = vmatpush1.msra.mxu0 %v2381_v0  ;;  %v1797_v0 = vld [vmem:[%s4990_s5 + $0xd8] sm:$0xff]  ;;  %v1780_v62 = vld [vmem:[%s4990_s5 + $0x50] sm:$0xff] }
 0x190   :  { %1278 = vmatprep.mubr.f32.mxu0 %v4998_v46  ;;  %1462 = vmatprep.mubr.f32.mxu1 %v4998_v46  ;;  %2724 = vtanh.f32 %v748_v34  ;;  %v1778_v34 = vld [vmem:[%s4990_s5 + $0x40] sm:$0xff] }
 0x191   :  { %1564 = vmatprep.subr.mxu0 %v2380_v52  ;;  %2726 = vtanh.f32 %v752_v45  ;;  %v1795_v52 = vld [vmem:[%s4990_s5 + $0xc8] sm:$0xff] }
 0x192   :  { %1279 = vmatmul.mubr.f32.gmra.mxu0 %v4039_v37 }
 0x193   :  { %1463 = vmatmul.mubr.f32.gmra.mxu1 %v4099_v15  ;;  %1565 = vmatpush1.msra.mxu0 %v2379_v4  ;;  %v1794_v4 = vld [vmem:[%s4990_s5 + $0xc0] sm:$0xff] }
 0x194   :  { %1566 = vmatprep.subr.mxu0 %v2378_v14  ;;  %1284 = vmatprep.mubr.f32.mxu0 %v4998_v46  ;;  %v1793_v14 = vld [vmem:[%s4990_s5 + $0xb8] sm:$0xff] }
 0x195   :  { %1567 = vmatpush1.msra.mxu0 %v2377_v29  ;;  %1468 = vmatprep.mubr.f32.mxu1 %v4998_v46  ;;  %v1777_v29 = vld [vmem:[%s4990_s5 + $0x38] sm:$0xff] }
 0x196   :  { %1285 = vmatmul.mubr.f32.gmra.mxu0 %v4067_v5  ;;  %1568 = vmatprep.subr.mxu0 %v2376_v11  ;;  %v1792_v11 = vld [vmem:[%s4990_s5 + $0xb0] sm:$0xff] }
 0x197   :  { %1469 = vmatmul.mubr.f32.gmra.mxu1 %v4123_v61  ;;  %1569 = vmatpush1.msra.mxu0 %v2375_v8  ;;  %v1776_v8 = vld [vmem:[%s4990_s5 + $0x30] sm:$0xff] }
 0x198   :  { %1570 = vmatprep.subr.mxu0 %v2374_v44  ;;  %1290 = vmatprep.mubr.f32.mxu0 %v4998_v46  ;;  %v1791_v44 = vld [vmem:[%s4990_s5 + $0xa8] sm:$0xff] }
 0x199   :  { %1474 = vmatprep.mubr.f32.mxu1 %v4998_v46  ;;  %1571 = vmatpush1.msra.mxu0 %v2373_v41  ;;  %v1775_v41 = vld [vmem:[%s4990_s5 + $0x28] sm:$0xff] }
 0x19a   :  { %1291 = vmatmul.mubr.f32.gmra.mxu0 %v4099_v15  ;;  %1572 = vmatprep.subr.mxu0 %v2372_v48  ;;  %v1790_v48 = vld [vmem:[%s4990_s5 + $0xa0] sm:$0xff] }
 0x19b   :  { %1475 = vmatmul.mubr.f32.gmra.mxu1 %v4153_v30  ;;  %1573 = vmatpush1.msra.mxu0 %v2371_v54  ;;  %v1774_v54 = vld [vmem:[%s4990_s5 + $0x20] sm:$0xff] }
 0x19c   :  { %1296 = vmatprep.mubr.f32.mxu0 %v4998_v46  ;;  %1480 = vmatprep.mubr.f32.mxu1 %v4998_v46 }
 0x19d   :  { %1574 = vmatprep.subr.mxu0 %v2370_v6  ;;  %v2725_v9 = vpop.eup %2724  ;;  %v1789_v6 = vld [vmem:[%s4990_s5 + $0x98] sm:$0xff] }
 0x19e   :  { %1297 = vmatmul.mubr.f32.gmra.mxu0 %v4123_v61  ;;  %v838_v53 = vmax.f32 %v2723_v7, %v2725_v9  ;;  %v2727_v23 = vpop.eup %2726  ;;  %v1771_v7 = vld [vmem:[%s4990_s5 + $0x8] sm:$0xff]  ;;  %v1786_v9 = vld [vmem:[%s4990_s5 + $0x80] sm:$0xff] }
 0x19f   :  { %1481 = vmatmul.mubr.f32.gmra.mxu1 %v4180_v49  ;;  %1575 = vmatpush1.msra.mxu0 %v2369_v19  ;;  %v1773_v19 = vld [vmem:[%s4990_s5 + $0x18] sm:$0xff] }
 0x1a0   :  { %1576 = vmatprep.subr.mxu0 %v2368_v18  ;;  %1302 = vmatprep.mubr.f32.mxu0 %v4998_v46  ;;  %v852_v43 = vmax.f32 %v824_v55, %v838_v53  ;;  %v520_v55 = vpop.f32.mrf.mxu0  ;;  %v1788_v18 = vld [vmem:[%s4990_s5 + $0x90] sm:$0xff] }
 0x1a1   :  { %1486 = vmatprep.mubr.f32.mxu1 %v4998_v46  ;;  %1577 = vmatpush1.msra.mxu0 %v2367_v22  ;;  %v521_v31 = vadd.f32 %v520_v55, %v3834_v33  ;;  %v1848_v22 = vld [vmem:[%s4990_s5 + $0x270] sm:$0xff] }
 0x1a2   :  { %1303 = vmatmul.mubr.f32.gmra.mxu0 %v4153_v30  ;;  %1578 = vmatprep.subr.mxu0 %v2366_v1  ;;  %v1787_v1 = vld [vmem:[%s4990_s5 + $0x88] sm:$0xff] }
 0x1a3   :  { %1487 = vmatmul.mubr.f32.gmra.mxu1 %v4216_v13  ;;  %1579 = vmatpush1.msra.mxu0 %v2365_v56  ;;  %v754_v21 = vadd.f32 %v753_v20, %v521_v31  ;;  %v1841_v20 = vld [vmem:[%s4990_s5 + $0x238] sm:$0xff] }
 0x1a4   :  { %1308 = vmatprep.mubr.f32.mxu0 %v4998_v46  ;;  %1492 = vmatprep.mubr.f32.mxu1 %v4998_v46 }
 0x1a5   :  { %1580 = vmatprep.subr.mxu0 %v2364_v28  ;;  %2728 = vtanh.f32 %v754_v21 }
 0x1a6   :  { %1309 = vmatmul.mubr.f32.gmra.mxu0 %v4180_v49 }
 0x1a7   :  { %1493 = vmatmul.mubr.f32.gmra.mxu1 %v851_v10  ;;  %1581 = vmatpush1.msra.mxu0 %v2363_v60  ;;  %v1770_v60 = vld [vmem:[%s4990_s5] sm:$0xff] }
 0x1a8   :  { %1582 = vmatprep.subr.mxu0 %v2362_v24  ;;  %1314 = vmatprep.mubr.f32.mxu0 %v4998_v46  ;;  %v1833_v24 = vld [vmem:[%s4990_s5 + $0x1f8] sm:$0xff] }
 0x1a9   :  { %1583 = vmatpush1.msra.mxu0 %v2361_v63  ;;  %1498 = vmatprep.mubr.f32.mxu1 %v4998_v46 }
 0x1aa   :  { %1315 = vmatmul.mubr.f32.gmra.mxu0 %v4216_v13  ;;  %1584 = vmatprep.subr.mxu0 %v2360_v40  ;;  %v1845_v40 = vld [vmem:[%s4990_s5 + $0x258] sm:$0xff] }
 0x1ab   :  { %1499 = vmatmul.mubr.f32.gmra.mxu1 %v852_v43  ;;  %1585 = vmatpush1.msra.mxu0 %v2359_v57 }
 0x1ac   :  { %1586 = vmatprep.subr.mxu0 %v2358_v59  ;;  %1320 = vmatprep.mubr.f32.mxu0 %v4998_v46  ;;  %v1844_v59 = vld [vmem:[%s4990_s5 + $0x250] sm:$0xff] }
 0x1ad   :  { %1587 = vmatpush1.msra.mxu0 %v2357_v16 }
 0x1ae   :  { %1321 = vmatmul.mubr.f32.gmra.mxu0 %v851_v10  ;;  %1588 = vmatprep.subr.mxu0 %v2356_v3 }
 0x1af   :  { %1589 = vmatpush1.msra.mxu0 %v2355_v51  ;;  %1622 = vmatprep.mubr.f32.mxu0 %v4998_v46  ;;  %v1843_v51 = vld [vmem:[%s4990_s5 + $0x248] sm:$0xff] }
 0x1b0   :  { %2511 = vmatprep.subr.mxu0 %v4998_v46 }
 0x1b2   :  { %1623 = vmatmul.mubr.f32.vlgmr.msra.gmra.mxu0 %v4039_v37  ;;  %v2729_v33 = vpop.eup %2728 }
 0x1b3   :  { %1628 = vmatprep.mubr.f32.mxu0 %v4998_v46  ;;  %v839_v37 = vmax.f32 %v2727_v23, %v2729_v33  ;;  %2512 = vmatpush3.msra.mxu0 %v1849_v50  ;;  %v1840_v23 = vld [vmem:[%s4990_s5 + $0x230] sm:$0xff] }
 0x1b4   :  { %2513 = vmatprep.subr.mxu0 %v4998_v46 }
 0x1b5   :  { %2514 = vmatpush3.msra.mxu0 %v1848_v22 }
 0x1b6   :  { %1629 = vmatmul.mubr.f32.gmra.mxu0 %v4067_v5  ;;  %v853_v5 = vmax.f32 %v825_v47, %v839_v37  ;;  %v1783_v47 = vld [vmem:[%s4990_s5 + $0x68] sm:$0xff]  ;;  %2515 = vmatprep.subr.mxu0 %v4998_v46 }
 0x1b7   :  { %1634 = vmatprep.mubr.f32.mxu0 %v4998_v46  ;;  %2516 = vmatpush3.msra.mxu0 %v1847_v58  ;;  %v1839_v37 = vld [vmem:[%s4990_s5 + $0x228] sm:$0xff] }
 0x1b8   :  { %2517 = vmatprep.subr.mxu0 %v4998_v46 }
 0x1ba   :  { %1635 = vmatmul.mubr.f32.gmra.mxu0 %v4099_v15  ;;  %v1801_v15 = vld [vmem:[%s4990_s5 + $0xf8] sm:$0xff] }
 0x1bb   :  { %1640 = vmatprep.mubr.f32.mxu0 %v4998_v46  ;;  %2390 = vmatprep.subr.mxu1 %v1801_v15 }
 0x1be   :  { %1641 = vmatmul.mubr.f32.gmra.mxu0 %v4123_v61  ;;  %v1785_v61 = vld [vmem:[%s4990_s5 + $0x78] sm:$0xff] }
 0x1bf   :  { %1646 = vmatprep.mubr.f32.mxu0 %v4998_v46  ;;  %2391 = vmatpush3.msra.mxu1 %v1785_v61  ;;  %v1838_v61 = vld [vmem:[%s4990_s5 + $0x220] sm:$0xff] }
 0x1c2   :  { %1647 = vmatmul.mubr.f32.gmra.mxu0 %v4153_v30  ;;  %v1800_v30 = vld [vmem:[%s4990_s5 + $0xf0] sm:$0xff] }
 0x1c3   :  { %1652 = vmatprep.mubr.f32.mxu0 %v4998_v46  ;;  %2392 = vmatprep.subr.mxu1 %v1800_v30 }
 0x1c4   :  { %2393 = vmatpush3.msra.mxu1 %v1784_v39  ;;  %v1837_v39 = vld [vmem:[%s4990_s5 + $0x218] sm:$0xff] }
 0x1c5   :  { %2394 = vmatprep.subr.mxu1 %v1799_v42 }
 0x1c6   :  { %1653 = vmatmul.mubr.f32.gmra.mxu0 %v4180_v49  ;;  %2395 = vmatpush3.msra.mxu1 %v1783_v47  ;;  %v1798_v49 = vld [vmem:[%s4990_s5 + $0xe0] sm:$0xff]  ;;  %v1836_v47 = vld [vmem:[%s4990_s5 + $0x210] sm:$0xff] }
 0x1c7   :  { %1658 = vmatprep.mubr.f32.mxu0 %v4998_v46  ;;  %2396 = vmatprep.subr.mxu1 %v1798_v49 }
 0x1ca   :  { %1659 = vmatmul.mubr.f32.gmra.mxu0 %v4216_v13  ;;  %v1782_v13 = vld [vmem:[%s4990_s5 + $0x60] sm:$0xff] }
 0x1cb   :  { %1664 = vmatprep.mubr.f32.mxu0 %v4998_v46  ;;  %2397 = vmatpush3.msra.mxu1 %v1782_v13 }
 0x1cc   :  { %2398 = vmatprep.subr.mxu1 %v1797_v0 }
 0x1cd   :  { %2399 = vmatpush3.msra.mxu1 %v1781_v35  ;;  %v1835_v35 = vld [vmem:[%s4990_s5 + $0x208] sm:$0xff] }
 0x1ce   :  { %1665 = vmatmul.mubr.f32.gmra.mxu0 %v851_v10  ;;  %2400 = vmatprep.subr.mxu1 %v1796_v36  ;;  %v1846_v10 = vld [vmem:[%s4990_s5 + $0x260] sm:$0xff] }
 0x1cf   :  { %1670 = vmatprep.mubr.f32.mxu0 %v4998_v46  ;;  %2401 = vmatpush3.msra.mxu1 %v1780_v62 }
 0x1d0   :  { %2402 = vmatprep.subr.mxu1 %v1795_v52  ;;  %2518 = vmatpush3.msra.mxu0 %v1846_v10  ;;  %v1834_v52 = vld [vmem:[%s4990_s5 + $0x200] sm:$0xff] }
 0x1d1   :  { %2403 = vmatpush3.msra.mxu1 %v1779_v38  ;;  %2519 = vmatprep.subr.mxu0 %v4998_v46 }
 0x1d2   :  { %1671 = vmatmul.mubr.f32.gmra.mxu0 %v852_v43  ;;  %2404 = vmatprep.subr.mxu1 %v1794_v4 }
 0x1d3   :  { %1676 = vmatprep.mubr.f32.mxu0 %v4998_v46  ;;  %2405 = vmatpush3.msra.mxu1 %v1778_v34 }
 0x1d4   :  { %2406 = vmatprep.subr.mxu1 %v1793_v14  ;;  %2520 = vmatpush3.msra.mxu0 %v1845_v40 }
 0x1d5   :  { %2407 = vmatpush3.msra.mxu1 %v1777_v29  ;;  %2521 = vmatprep.subr.mxu0 %v4998_v46 }
 0x1d6   :  { %1677 = vmatmul.mubr.f32.gmra.mxu0 %v853_v5  ;;  %2408 = vmatprep.subr.mxu1 %v1792_v11 }
 0x1d7   :  { %2409 = vmatpush3.msra.mxu1 %v1776_v8  ;;  %2522 = vmatpush3.msra.mxu0 %v1844_v59 }
 0x1d8   :  { %2410 = vmatprep.subr.mxu1 %v1791_v44  ;;  %2523 = vmatprep.subr.mxu0 %v4998_v46 }
 0x1d9   :  { %2411 = vmatpush3.msra.mxu1 %v1775_v41  ;;  %2524 = vmatpush3.msra.mxu0 %v1843_v51 }
 0x1da   :  { %2412 = vmatprep.subr.mxu1 %v1790_v48  ;;  %2525 = vmatprep.subr.mxu0 %v4998_v46 }
 0x1db   :  { %2413 = vmatpush3.msra.mxu1 %v1774_v54  ;;  %2526 = vmatpush3.msra.mxu0 %v1842_v25 }
 0x1dc   :  { %2414 = vmatprep.subr.mxu1 %v1789_v6  ;;  %2527 = vmatprep.subr.mxu0 %v4998_v46 }
 0x1dd   :  { %2415 = vmatpush3.msra.mxu1 %v1773_v19  ;;  %2528 = vmatpush3.msra.mxu0 %v1841_v20 }
 0x1de   :  { %2416 = vmatprep.subr.mxu1 %v1788_v18  ;;  %2529 = vmatprep.subr.mxu0 %v4998_v46 }
 0x1df   :  { %2417 = vmatpush3.msra.mxu1 %v1772_v32  ;;  %2530 = vmatpush3.msra.mxu0 %v1840_v23 }
 0x1e0   :  { %2418 = vmatprep.subr.mxu1 %v1787_v1  ;;  %2531 = vmatprep.subr.mxu0 %v4998_v46 }
 0x1e1   :  { %2419 = vmatpush3.msra.mxu1 %v1771_v7  ;;  %2532 = vmatpush3.msra.mxu0 %v1839_v37 }
 0x1e2   :  { %2420 = vmatprep.subr.mxu1 %v1786_v9  ;;  %2533 = vmatprep.subr.mxu0 %v4998_v46 }
 0x1e3   :  { %2421 = vmatpush3.msra.mxu1 %v1770_v60  ;;  %2534 = vmatpush3.msra.mxu0 %v1838_v61 }
 0x1e4   :  { %2425 = vmatprep.subr.mxu1 %v1833_v24  ;;  %2535 = vmatprep.subr.mxu0 %v4998_v46 }
 0x1e5   :  { %2536 = vmatpush3.msra.mxu0 %v1837_v39  ;;  %2543 = vmatprep.mubr.msk.f32.mxu0 %vm2773_vm0, %v4998_v46 }
 0x1e6   :  { %2537 = vmatprep.subr.mxu0 %v4998_v46 }
 0x1e7   :  { %2538 = vmatpush3.msra.mxu0 %v1836_v47 }
 0x1e8   :  { %2539 = vmatprep.subr.mxu0 %v4998_v46 }
 0x1e9   :  { %2540 = vmatpush3.msra.mxu0 %v1835_v35 }
 0x1ea   :  { %2541 = vmatprep.subr.mxu0 %v4998_v46 }
 0x1eb   :  { %2542 = vmatpush3.msra.mxu0 %v1834_v52 }
 0x1ec   :  { %2581 = vmatprep.subr.mxu0 %v4998_v46 }
 0x214   :  { %v4486_v56 = vpop.f32.mrf.mxu1 }
 0x216   :  { %v4498_v28 = vpop.f32.mrf.mxu1 }
 0x218   :  { %v4510_v53 = vpop.f32.mrf.mxu0  ;;  %v4512_v63 = vpop.f32.mrf.mxu1 }
 0x21a   :  { %v4518_v57 = vpop.f32.mrf.mxu0  ;;  %v4520_v43 = vpop.f32.mrf.mxu1 }
 0x21c   :  { %v4526_v16 = vpop.f32.mrf.mxu0  ;;  %v4528_v3 = vpop.f32.mrf.mxu1 }
 0x21e   :  { %v4534_v27 = vpop.f32.mrf.mxu0  ;;  %v4536_v55 = vpop.f32.mrf.mxu1 }
 0x220   :  { %v4542_v2 = vpop.f32.mrf.mxu0  ;;  %v4544_v31 = vpop.f32.mrf.mxu1 }
 0x222   :  { %v4550_v45 = vpop.f32.mrf.mxu0  ;;  %v4552_v21 = vpop.f32.mrf.mxu1 }
 0x224   :  { %v4558_v33 = vpop.f32.mrf.mxu0 }
 0x225   :  { %v1134_v5 = vpop.f32.mrf.mxu1 }
 0x226   :  { %v4564_v15 = vpop.f32.mrf.mxu0 }
 0x227   :  { %v1136_v30 = vpop.f32.mrf.mxu1 }
 0x22a   :  { %v1009_v42 = vpop.f32.mrf.mxu0 }
 0x22b   :  { %v1135_v49 = vadd.f32 %v1134_v5, %v1009_v42  ;;  %v4578_v13 = vpop.f32.mrf.mxu1 }
 0x22c   :  { %v1011_v0 = vpop.f32.mrf.mxu0 }
 0x22d   :  { %v1137_v36 = vadd.f32 %v1136_v30, %v1011_v0  ;;  %v4584_v62 = vpop.f32.mrf.mxu1 }
 0x230   :  { %v4592_v38 = vpop.f32.mrf.mxu0  ;;  %v4594_v4 = vpop.f32.mrf.mxu1 }
 0x232   :  { %v4597_v34 = vpop.f32.mrf.mxu0  ;;  %v4599_v14 = vpop.f32.mrf.mxu1 }
 0x235   :  { %v4601_v29 = vpop.f32.mrf.mxu0 }
 0x236   :  { %v4603_v11 = vpop.f32.mrf.mxu1 }
 0x237   :  { %v4605_v8 = vpop.f32.mrf.mxu0 }
 0x238   :  { %v4607_v44 = vpop.f32.mrf.mxu1 }
 0x23b   :  { %v4609_v41 = vpop.f32.mrf.mxu0  ;;  %v4611_v48 = vpop.f32.mrf.mxu1 }
 0x23c   :  { %5002 = vst [vmem:[#allocation2_spill] sm:$0xff] %v4611_v48 }
 0x23d   :  { %v4613_v54 = vpop.f32.mrf.mxu0  ;;  %v4615_v6 = vpop.f32.mrf.mxu1 }
 0x23e   :  { %5003 = vst [vmem:[#allocation3_spill] sm:$0xff] %v4615_v6 }
 0x240   :  { %v4617_v19 = vpop.f32.mrf.mxu0 }
 0x241   :  { %5004 = vst [vmem:[#allocation4_spill] sm:$0xff] %v4617_v19  ;;  %v4619_v50 = vpop.f32.mrf.mxu1 }
 0x242   :  { %5005 = vst [vmem:[#allocation5_spill] sm:$0xff] %v4619_v50  ;;  %v4621_v18 = vpop.f32.mrf.mxu0 }
 0x243   :  { %5006 = vst [vmem:[#allocation6_spill] sm:$0xff] %v4621_v18  ;;  %v4623_v32 = vpop.f32.mrf.mxu1  ;;  %v1703_v18 = vld [vmem:[%s4991_s4] sm:$0x3] }
 0x244   :  { %5007 = vst [vmem:[#allocation7_spill] sm:$0xff] %v4623_v32 }
 0x246   :  { %v4625_v22 = vpop.f32.mrf.mxu0 }
 0x247   :  { %5008 = vst [vmem:[#allocation8_spill] sm:$0xff] %v4625_v22  ;;  %v1446_v7 = vpop.f32.mrf.mxu1 }
 0x248   :  { %v4627_v1 = vpop.f32.mrf.mxu0 }
 0x249   :  { %5009 = vst [vmem:[#allocation9_spill] sm:$0xff] %v4627_v1  ;;  %v1448_v60 = vpop.f32.mrf.mxu1  ;;  %v1113_v1 = vadd.f32 %v4498_v28, %v4518_v57  ;;  %v5014_v57 = vsub.s32 0, %v3798_v12 }
 0x24a   :  { %v1268_v58 = vpop.f32.mrf.mxu0 }
 0x24b   :  { %v1452_v40 = vpop.f32.mrf.mxu1 }
 0x24c   :  { %v1270_v9 = vpop.f32.mrf.mxu0 }
 0x24d   :  { %v1454_v25 = vpop.f32.mrf.mxu1 }
 0x24e   :  { %v1274_v10 = vpop.f32.mrf.mxu0 }
 0x24f   :  { %v1458_v37 = vpop.f32.mrf.mxu1 }
 0x250   :  { %v1276_v24 = vpop.f32.mrf.mxu0 }
 0x251   :  { %v1460_v42 = vpop.f32.mrf.mxu1 }
 0x252   :  { %v1280_v59 = vpop.f32.mrf.mxu0 }
 0x253   :  { %v1464_v35 = vpop.f32.mrf.mxu1 }
 0x254   :  { %v1282_v51 = vpop.f32.mrf.mxu0 }
 0x255   :  { %v4641_v26 = vpop.f32.mrf.mxu1 }
 0x256   :  { %v1286_v20 = vpop.f32.mrf.mxu0 }
 0x258   :  { %v1288_v23 = vpop.f32.mrf.mxu0 }
 0x25a   :  { %v1292_v5 = vpop.f32.mrf.mxu0 }
 0x25b   :  { %v4629_v61 = vadd.f32 %v1292_v5, %v1135_v49  ;;  %v4647_v49 = vpop.f32.mrf.mxu1  ;;  %v1111_v5 = vadd.f32 %v4486_v56, %v4510_v53  ;;  %v1119_v56 = vadd.f32 %v4520_v43, %v4534_v27 }
 0x25c   :  { %v1294_v30 = vpop.f32.mrf.mxu0 }
 0x25d   :  { %v4631_v39 = vadd.f32 %v1294_v30, %v1137_v36  ;;  %v1327_v50 = vadd.f32 %v1268_v58, %v1111_v5  ;;  %v4657_v22 = vpop.f32.mrf.mxu1  ;;  %v4672_v58 = vrot.slane %v1703_v18, %v5014_v57  ;;  %v1123_v5 = vadd.f32 %v4528_v3, %v4542_v2 }
 0x25e   :  { %v4633_v47 = vpop.f32.mrf.mxu0  ;;  %v1330_v19 = vadd.f32 %v1276_v24, %v1119_v56  ;;  %v1129_v3 = vadd.f32 %v4544_v31, %v4558_v33 }
 0x25f   :  { %v1505_v28 = vadd.f32 %v1446_v7, %v1327_v50  ;;  %v1331_v43 = vadd.f32 %v1280_v59, %v1123_v5  ;;  %v1125_v50 = vadd.f32 %v4536_v55, %v4550_v45  ;;  %v1131_v59 = vadd.f32 %v4552_v21, %v4564_v15 }
 0x260   :  { %v4635_v0 = vpop.f32.mrf.mxu0 }
 0x261   :  { %v1509_v45 = vadd.f32 %v1458_v37, %v1331_v43 }
 0x262   :  { %v4637_v52 = vpop.f32.mrf.mxu0 }
 0x264   :  { %v4639_v46 = vpop.f32.mrf.mxu0 }
 0x266   :  { %v4643_v17 = vpop.f32.mrf.mxu0 }
 0x268   :  { %v4645_v32 = vpop.f32.mrf.mxu0 }
 0x269   :  { %5010 = vst [vmem:[#allocation10_spill] sm:$0xff] %v4645_v32  ;;  %v1328_v32 = vadd.f32 %v1270_v9, %v1113_v1  ;;  %v5015_v1 = vsub.s32 1, %v3798_v12 }
 0x26a   :  { %v4649_v36 = vpop.f32.mrf.mxu0 }
 0x26b   :  { %5011 = vst [vmem:[#allocation11_spill] sm:$0xff] %v4649_v36  ;;  %v1117_v36 = vadd.f32 %v4512_v63, %v4526_v16  ;;  %v1506_v16 = vadd.f32 %v1448_v60, %v1328_v32  ;;  %v4680_v9 = vrot.slane %v1703_v18, %v5015_v1  ;;  %v1332_v32 = vadd.f32 %v1282_v51, %v1125_v50 }
 0x26c   :  { %v4653_v30 = vpop.f32.mrf.mxu0  ;;  %v1508_v60 = vadd.f32 %v1454_v25, %v1330_v19 }
 0x26d   :  { %5012 = vst [vmem:[#allocation12_spill] sm:$0xff] %v4653_v30  ;;  %v1329_v53 = vadd.f32 %v1274_v10, %v1117_v36  ;;  %v1510_v57 = vadd.f32 %v1460_v42, %v1332_v32  ;;  %v1143_v42 = vadd.f32 %v4584_v62, %v4597_v34 }
 0x26e   :  { %v4659_v6 = vpop.f32.mrf.mxu0 }
 0x26f   :  { %5013 = vst [vmem:[#allocation13_spill] sm:$0xff] %v4659_v6  ;;  %v4676_v6 = vpop.f32.mrf.mxu1  ;;  %v1507_v36 = vadd.f32 %v1452_v40, %v1329_v53  ;;  %v1334_v53 = vadd.f32 %v1288_v23, %v1131_v59 }
 0x270   :  { %v4666_v48 = vpop.f32.mrf.mxu0 }
 0x271   :  { %v4687_v2 = vpop.f32.mrf.mxu1  ;;  %v1512_v23 = vadd.f32 %v4641_v26, %v1334_v53  ;;  %v1338_v26 = vadd.f32 %v4635_v0, %v1143_v42  ;;  %v5018_v53 = vld [vmem:[#allocation10_spill] sm:$0xff]  ;;  %v5023_v42 = vld [vmem:[#allocation5_spill] sm:$0xff] }
 0x272   :  { %v1624_v30 = vpop.f32.mrf.mxu0 }
 0x273   :  { %v1683_v63 = vadd.f32 %v1624_v30, %v1505_v28  ;;  %v1333_v30 = vadd.f32 %v1286_v20, %v1129_v3  ;;  %v1482_v31 = vpop.f32.mrf.mxu1  ;;  %v1141_v20 = vadd.f32 %v4578_v13, %v4592_v38  ;;  %v1513_v13 = vadd.f32 %v4647_v49, %v4629_v61 }
 0x274   :  { %v1626_v27 = vpop.f32.mrf.mxu0  ;;  %v1147_v38 = vadd.f32 %v4594_v4, %v4601_v29 }
 0x275   :  { %v1715_v7 = vadd.f32 %v4672_v58, %v1683_v63  ;;  %v1684_v10 = vadd.f32 %v1626_v27, %v1506_v16  ;;  %v1511_v25 = vadd.f32 %v1464_v35, %v1333_v30  ;;  %v1484_v37 = vpop.f32.mrf.mxu1  ;;  %v1337_v1 = vadd.f32 %v4633_v47, %v1141_v20  ;;  %v5017_v30 = vld [vmem:[#allocation2_spill] sm:$0xff] }
 0x276   :  { %v1630_v24 = vpop.f32.mrf.mxu0  ;;  %v1514_v47 = vadd.f32 %v4657_v22, %v4631_v39  ;;  %v1339_v4 = vadd.f32 %v4637_v52, %v1147_v38  ;;  %v1155_v52 = vadd.f32 %v4607_v44, %v4613_v54 }
 0x277   :  { %v1716_v12 = vadd.f32 %v4680_v9, %v1684_v10  ;;  %v1685_v18 = vadd.f32 %v1630_v24, %v1507_v36  ;;  %2730 = vtanh.f32 %v1715_v7  ;;  %v1488_v50 = vpop.f32.mrf.mxu1  ;;  %v1149_v10 = vadd.f32 %v4599_v14, %v4605_v8 }
 0x278   :  { %v1632_v55 = vpop.f32.mrf.mxu0  ;;  %v1515_v61 = vadd.f32 %v4676_v6, %v1337_v1  ;;  %v1153_v24 = vadd.f32 %v4603_v11, %v4609_v41  ;;  %v1516_v6 = vadd.f32 %v4687_v2, %v1338_v26  ;;  %v1517_v41 = vadd.f32 %v1482_v31, %v1339_v4 }
 0x279   :  { %2732 = vtanh.f32 %v1716_v12  ;;  %v1717_v40 = vadd.f32 %v4672_v58, %v1685_v18  ;;  %v1686_v56 = vadd.f32 %v1632_v55, %v1508_v60  ;;  %v1340_v22 = vadd.f32 %v4639_v46, %v1149_v10  ;;  %v1490_v39 = vpop.f32.mrf.mxu1  ;;  %v5027_v10 = vld [vmem:[#allocation13_spill] sm:$0xff] }
 0x27a   :  { %v1636_v33 = vpop.f32.mrf.mxu0  ;;  %v1341_v18 = vadd.f32 %v4643_v17, %v1153_v24 }
 0x27b   :  { %v1718_v51 = vadd.f32 %v4680_v9, %v1686_v56  ;;  %v1687_v28 = vadd.f32 %v1636_v33, %v1509_v45  ;;  %2734 = vtanh.f32 %v1717_v40  ;;  %v5016_v45 = vld [vmem:[#allocation4_spill] sm:$0xff]  ;;  %v1494_v56 = vpop.f32.mrf.mxu1  ;;  %v1518_v33 = vadd.f32 %v1484_v37, %v1340_v22 }
 0x27c   :  { %v1638_v19 = vpop.f32.mrf.mxu0  ;;  %v1159_v40 = vadd.f32 %v5017_v30, %v5016_v45 }
 0x27d   :  { %2736 = vtanh.f32 %v1718_v51  ;;  %v1719_v21 = vadd.f32 %v4672_v58, %v1687_v28  ;;  %v1688_v15 = vadd.f32 %v1638_v19, %v1510_v57  ;;  %v1342_v51 = vadd.f32 %v5018_v53, %v1155_v52  ;;  %v5019_v28 = vld [vmem:[#allocation6_spill] sm:$0xff]  ;;  %v5020_v57 = vld [vmem:[#allocation3_spill] sm:$0xff]  ;;  %v1816_v53 = vld [vmem:[%s4990_s5 + $0x170] sm:$0xff] }
 0x27e   :  { %v1642_v5 = vpop.f32.mrf.mxu0  ;;  %v1161_v19 = vadd.f32 %v5020_v57, %v5019_v28  ;;  %v1815_v57 = vld [vmem:[%s4990_s5 + $0x168] sm:$0xff] }
 0x27f   :  { %v1720_v63 = vadd.f32 %v4680_v9, %v1688_v15  ;;  %v1689_v16 = vadd.f32 %v1642_v5, %v1511_v25  ;;  %2738 = vtanh.f32 %v1719_v21  ;;  %v5021_v21 = vld [vmem:[#allocation11_spill] sm:$0xff]  ;;  %v1519_v25 = vadd.f32 %v1488_v50, %v1341_v18  ;;  %v5025_v50 = vld [vmem:[#allocation9_spill] sm:$0xff] }
 0x280   :  { %v1644_v43 = vpop.f32.mrf.mxu0  ;;  %v1343_v15 = vadd.f32 %v5021_v21, %v1159_v40  ;;  %v1520_v26 = vadd.f32 %v1490_v39, %v1342_v51  ;;  %v1830_v21 = vld [vmem:[%s4990_s5 + $0x1e0] sm:$0xff] }
 0x281   :  { %2740 = vtanh.f32 %v1720_v63  ;;  %v1721_v35 = vadd.f32 %v4672_v58, %v1689_v16  ;;  %v1690_v27 = vadd.f32 %v1644_v43, %v1512_v23  ;;  %v5022_v23 = vld [vmem:[#allocation8_spill] sm:$0xff]  ;;  %v1496_v43 = vpop.f32.mrf.mxu1 }
 0x282   :  { %v1648_v7 = vpop.f32.mrf.mxu0  ;;  %v1165_v1 = vadd.f32 %v5023_v42, %v5022_v23  ;;  %v1827_v42 = vld [vmem:[%s4990_s5 + $0x1c8] sm:$0xff] }
 0x283   :  { %v1722_v62 = vadd.f32 %v4680_v9, %v1690_v27  ;;  %v1691_v34 = vadd.f32 %v1648_v7, %v1513_v13  ;;  %2742 = vtanh.f32 %v1721_v35  ;;  %v5024_v35 = vld [vmem:[#allocation12_spill] sm:$0xff]  ;;  %v1500_v24 = vpop.f32.mrf.mxu1 }
 0x284   :  { %v1650_v36 = vpop.f32.mrf.mxu0  ;;  %v2731_v49 = vpop.eup %2730  ;;  %v1344_v27 = vadd.f32 %v5024_v35, %v1161_v19  ;;  %v1826_v35 = vld [vmem:[%s4990_s5 + $0x1c0] sm:$0xff] }
 0x285   :  { %2744 = vtanh.f32 %v1722_v62  ;;  %v1723_v29 = vadd.f32 %v4672_v58, %v1691_v34  ;;  %v1692_v0 = vadd.f32 %v1650_v36, %v1514_v47  ;;  %v5026_v34 = vld [vmem:[#allocation7_spill] sm:$0xff]  ;;  %v1345_v36 = vadd.f32 %v5027_v10, %v1165_v1  ;;  %v1808_v10 = vld [vmem:[%s4990_s5 + $0x130] sm:$0xff] }
 0x286   :  { %v2733_v3 = vpop.eup %2732  ;;  %v1654_v32 = vpop.f32.mrf.mxu0  ;;  %v1167_v47 = vadd.f32 %v5026_v34, %v5025_v50  ;;  %v1809_v50 = vld [vmem:[%s4990_s5 + $0x138] sm:$0xff] }
 0x287   :  { %v1724_v14 = vadd.f32 %v4680_v9, %v1692_v0  ;;  %v1693_v8 = vadd.f32 %v1654_v32, %v1515_v61  ;;  %v1755_v12 = vmax.f32 %v2731_v49, %v2733_v3  ;;  %2746 = vtanh.f32 %v1723_v29 }
 0x288   :  { %v1656_v60 = vpop.f32.mrf.mxu0  ;;  %v2735_v59 = vpop.eup %2734  ;;  %v1521_v0 = vadd.f32 %v1494_v56, %v1343_v15  ;;  %v1522_v32 = vadd.f32 %v1496_v43, %v1344_v27  ;;  %v1346_v39 = vadd.f32 %v4666_v48, %v1167_v47  ;;  %v1523_v52 = vadd.f32 %v1500_v24, %v1345_v36  ;;  %v1817_v48 = vld [vmem:[%s4990_s5 + $0x178] sm:$0xff]  ;;  %v1832_v56 = vld [vmem:[%s4990_s5 + $0x1f0] sm:$0xff]  ;;  %v1814_v15 = vld [vmem:[%s4990_s5 + $0x160] sm:$0xff] }
 0x289   :  { %2748 = vtanh.f32 %v1724_v14  ;;  %v1725_v11 = vadd.f32 %v4672_v58, %v1693_v8  ;;  %v1694_v46 = vadd.f32 %v1656_v60, %v1516_v6  ;;  %v1811_v43 = vld [vmem:[%s4990_s5 + $0x148] sm:$0xff]  ;;  %v1824_v47 = vld [vmem:[%s4990_s5 + $0x1b0] sm:$0xff]  ;;  %v1821_v24 = vld [vmem:[%s4990_s5 + $0x198] sm:$0xff] }
 0x28a   :  { %v2737_v55 = vpop.eup %2736  ;;  %v1660_v2 = vpop.f32.mrf.mxu0 }
 0x28b   :  { %v1726_v44 = vadd.f32 %v4680_v9, %v1694_v46  ;;  %v1695_v17 = vadd.f32 %v1660_v2, %v1517_v41  ;;  %v1756_v54 = vmax.f32 %v2735_v59, %v2737_v55  ;;  %2750 = vtanh.f32 %v1725_v11  ;;  %v1502_v41 = vpop.f32.mrf.mxu1 }
 0x28c   :  { %v1662_v31 = vpop.f32.mrf.mxu0  ;;  %v2739_v20 = vpop.eup %2738  ;;  %v1524_v40 = vadd.f32 %v1502_v41, %v1346_v39  ;;  %v1820_v39 = vld [vmem:[%s4990_s5 + $0x190] sm:$0xff]  ;;  %v2078_v41 = vld [vmem:[%s4992_s7 + $0x58] sm:$0xff] }
 0x28d   :  { %2752 = vtanh.f32 %v1726_v44  ;;  %v1727_v5 = vadd.f32 %v4672_v58, %v1695_v17  ;;  %v1696_v63 = vadd.f32 %v1662_v31, %v1518_v33  ;;  %v1765_v37 = vmax.f32 %v1755_v12, %v1756_v54  ;;  %v1831_v54 = vld [vmem:[%s4990_s5 + $0x1e8] sm:$0xff] }
 0x28e   :  { %v2741_v16 = vpop.eup %2740  ;;  %v1666_v13 = vpop.f32.mrf.mxu0 }
 0x28f   :  { %v1728_v38 = vadd.f32 %v4680_v9, %v1696_v63  ;;  %v1697_v7 = vadd.f32 %v1666_v13, %v1519_v25  ;;  %v1757_v62 = vmax.f32 %v2739_v20, %v2741_v16  ;;  %2754 = vtanh.f32 %v1727_v5  ;;  %v1829_v25 = vld [vmem:[%s4990_s5 + $0x1d8] sm:$0xff]  ;;  %v1828_v63 = vld [vmem:[%s4990_s5 + $0x1d0] sm:$0xff]  ;;  %v1810_v13 = vld [vmem:[%s4990_s5 + $0x140] sm:$0xff] }
 0x290   :  { %v1668_v61 = vpop.f32.mrf.mxu0  ;;  %v2743_v49 = vpop.eup %2742  ;;  %v1813_v5 = vld [vmem:[%s4990_s5 + $0x158] sm:$0xff]  ;;  %v1812_v16 = vld [vmem:[%s4990_s5 + $0x150] sm:$0xff] }
 0x291   :  { %2756 = vtanh.f32 %v1728_v38  ;;  %v1729_v4 = vadd.f32 %v4672_v58, %v1697_v7  ;;  %v1698_v29 = vadd.f32 %v1668_v61, %v1520_v26  ;;  %v1825_v7 = vld [vmem:[%s4990_s5 + $0x1b8] sm:$0xff]  ;;  %v1823_v61 = vld [vmem:[%s4990_s5 + $0x1a8] sm:$0xff] }
 0x292   :  { %v2745_v3 = vpop.eup %2744  ;;  %v1672_v22 = vpop.f32.mrf.mxu0 }
 0x293   :  { %v1730_v14 = vadd.f32 %v4680_v9, %v1698_v29  ;;  %v1699_v8 = vadd.f32 %v1672_v22, %v1521_v0  ;;  %v1758_v6 = vmax.f32 %v2743_v49, %v2745_v3  ;;  %2758 = vtanh.f32 %v1729_v4  ;;  %v1807_v4 = vld [vmem:[%s4990_s5 + $0x128] sm:$0xff]  ;;  %v1822_v0 = vld [vmem:[%s4990_s5 + $0x1a0] sm:$0xff] }
 0x294   :  { %v1674_v12 = vpop.f32.mrf.mxu0  ;;  %v2747_v18 = vpop.eup %2746  ;;  %v1806_v3 = vld [vmem:[%s4990_s5 + $0x120] sm:$0xff] }
 0x295   :  { %2760 = vtanh.f32 %v1730_v14  ;;  %v1731_v60 = vadd.f32 %v4672_v58, %v1699_v8  ;;  %v1700_v59 = vadd.f32 %v1674_v12, %v1522_v32  ;;  %v1766_v11 = vmax.f32 %v1757_v62, %v1758_v6  ;;  %v1805_v32 = vld [vmem:[%s4990_s5 + $0x118] sm:$0xff]  ;;  %v1804_v14 = vld [vmem:[%s4990_s5 + $0x110] sm:$0xff]  ;;  %v1819_v6 = vld [vmem:[%s4990_s5 + $0x188] sm:$0xff] }
 0x296   :  { %v2749_v46 = vpop.eup %2748  ;;  %v1678_v55 = vpop.f32.mrf.mxu0  ;;  %v5028_v8 = vmov 0.0   ;;  %v1803_v12 = vld [vmem:[%s4990_s5 + $0x108] sm:$0xff] }
 0x297   :  { %v1732_v45 = vadd.f32 %v4680_v9, %v1700_v59  ;;  %v1701_v30 = vadd.f32 %v1678_v55, %v1523_v52  ;;  %1921 = vmatprep.mubr.f32.mxu1 %v1766_v11  ;;  %v1759_v2 = vmax.f32 %v2747_v18, %v2749_v46  ;;  %2762 = vtanh.f32 %v1731_v60  ;;  %v1818_v52 = vld [vmem:[%s4990_s5 + $0x180] sm:$0xff]  ;;  %v2082_v60 = vld [vmem:[%s4992_s7 + $0x78] sm:$0xff]  ;;  %v2081_v59 = vld [vmem:[%s4992_s7 + $0x70] sm:$0xff] }
 0x298   :  { %v1680_v33 = vpop.f32.mrf.mxu0  ;;  %1922 = vmatmul.mubr.f32.vlgmr.msra.gmra.mxu1 %v1765_v37  ;;  %v2751_v51 = vpop.eup %2750  ;;  %v1802_v18 = vld [vmem:[%s4990_s5 + $0x100] sm:$0xff]  ;;  %v2080_v11 = vld [vmem:[%s4992_s7 + $0x68] sm:$0xff]  ;;  %v2077_v55 = vld [vmem:[%s4992_s7 + $0x50] sm:$0xff] }
 0x299   :  { %2764 = vtanh.f32 %v1732_v45  ;;  %v1733_v44 = vadd.f32 %v4672_v58, %v1701_v30  ;;  %v1702_v17 = vadd.f32 %v1680_v33, %v1524_v40  ;;  %2426 = vmatpush3.msra.mxu1 %v1817_v48  ;;  %v2079_v46 = vld [vmem:[%s4992_s7 + $0x60] sm:$0xff]  ;;  %v2076_v48 = vld [vmem:[%s4992_s7 + $0x48] sm:$0xff]  ;;  %v2074_v30 = vld [vmem:[%s4992_s7 + $0x38] sm:$0xff] }
 0x29a   :  { %v2753_v28 = vpop.eup %2752  ;;  %2427 = vmatprep.subr.mxu1 %v1832_v56  ;;  %v2075_v45 = vld [vmem:[%s4992_s7 + $0x40] sm:$0xff]  ;;  %v2073_v40 = vld [vmem:[%s4992_s7 + $0x30] sm:$0xff]  ;;  %v2072_v56 = vld [vmem:[%s4992_s7 + $0x28] sm:$0xff] }
 0x29b   :  { %v1734_v19 = vadd.f32 %v4680_v9, %v1702_v17  ;;  %2428 = vmatpush3.msra.mxu1 %v1816_v53  ;;  %v1760_v58 = vmax.f32 %v2751_v51, %v2753_v28  ;;  %2766 = vtanh.f32 %v1733_v44  ;;  %v2070_v33 = vld [vmem:[%s4992_s7 + $0x18] sm:$0xff]  ;;  %v2069_v53 = vld [vmem:[%s4992_s7 + $0x10] sm:$0xff]  ;;  %v2068_v51 = vld [vmem:[%s4992_s7 + $0x8] sm:$0xff] }
 0x29c   :  { %2429 = vmatprep.subr.mxu1 %v1831_v54  ;;  %v2755_v31 = vpop.eup %2754  ;;  %v2067_v44 = vld [vmem:[%s4992_s7] sm:$0xff]  ;;  %v2176_v17 = vld [vmem:[%s4993_s9 + $0x78] sm:$0xff]  ;;  %v2175_v54 = vld [vmem:[%s4993_s9 + $0x70] sm:$0xff] }
 0x29d   :  { %2768 = vtanh.f32 %v1734_v19  ;;  %2430 = vmatpush3.msra.mxu1 %v1815_v57  ;;  %v4771_v9 = vmax.f32 %v1759_v2, %v1760_v58  ;;  %v2071_v2 = vld [vmem:[%s4992_s7 + $0x20] sm:$0xff]  ;;  %v2174_v28 = vld [vmem:[%s4993_s9 + $0x68] sm:$0xff]  ;;  %v2172_v19 = vld [vmem:[%s4993_s9 + $0x58] sm:$0xff] }
 0x29e   :  { %v2757_v20 = vpop.eup %2756  ;;  %2431 = vmatprep.subr.mxu1 %v1830_v21  ;;  %v2173_v57 = vld [vmem:[%s4993_s9 + $0x60] sm:$0xff]  ;;  %v2171_v21 = vld [vmem:[%s4993_s9 + $0x50] sm:$0xff]  ;;  %v2170_v58 = vld [vmem:[%s4993_s9 + $0x48] sm:$0xff] }
 0x29f   :  { %2432 = vmatpush3.msra.mxu1 %v1814_v15  ;;  %v1761_v37 = vmax.f32 %v2755_v31, %v2757_v20 }
 0x2a0   :  { %2433 = vmatprep.subr.mxu1 %v1829_v25  ;;  %v2759_v23 = vpop.eup %2758 }
 0x2a1   :  { %2434 = vmatpush3.msra.mxu1 %v1813_v5  ;;  %v2387_v5 = vld [vmem:[%s4994_s6] ss:$0 sm:$0xff] }
 0x2a2   :  { %v2761_v1 = vpop.eup %2760  ;;  %2435 = vmatprep.subr.mxu1 %v1828_v63 }
 0x2a3   :  { %2436 = vmatpush3.msra.mxu1 %v1812_v16  ;;  %v1762_v27 = vmax.f32 %v2759_v23, %v2761_v1 }
 0x2a4   :  { %2437 = vmatprep.subr.mxu1 %v1827_v42  ;;  %v2763_v38 = vpop.eup %2762 }
 0x2a5   :  { %2438 = vmatpush3.msra.mxu1 %v1811_v43  ;;  %v1768_v26 = vmax.f32 %v1761_v37, %v1762_v27  ;;  %v2169_v43 = vld [vmem:[%s4993_s9 + $0x40] sm:$0xff]  ;;  %v2167_v27 = vld [vmem:[%s4993_s9 + $0x30] sm:$0xff] }
 0x2a6   :  { %v2765_v62 = vpop.eup %2764  ;;  %2439 = vmatprep.subr.mxu1 %v1826_v35  ;;  %v2168_v35 = vld [vmem:[%s4993_s9 + $0x38] sm:$0xff] }
 0x2a7   :  { %v1763_v34 = vmax.f32 %v2763_v38, %v2765_v62  ;;  %2440 = vmatpush3.msra.mxu1 %v1810_v13  ;;  %1991 = vmatprep.mubr.f32.mxu1 %v1768_v26  ;;  %v2166_v13 = vld [vmem:[%s4993_s9 + $0x28] sm:$0xff]  ;;  %v2165_v38 = vld [vmem:[%s4993_s9 + $0x20] sm:$0xff]  ;;  %v2163_v26 = vld [vmem:[%s4993_s9 + $0x10] sm:$0xff] }
 0x2a8   :  { %2441 = vmatprep.subr.mxu1 %v1825_v7  ;;  %v2767_v36 = vpop.eup %2766  ;;  %v2164_v7 = vld [vmem:[%s4993_s9 + $0x18] sm:$0xff]  ;;  %v2162_v62 = vld [vmem:[%s4993_s9 + $0x8] sm:$0xff] }
 0x2a9   :  { %2442 = vmatpush3.msra.mxu1 %v1809_v50  ;;  %v2161_v50 = vld [vmem:[%s4993_s9] sm:$0xff] }
 0x2aa   :  { %v2769_v49 = vpop.eup %2768  ;;  %2443 = vmatprep.subr.mxu1 %v1824_v47 }
 0x2ab   :  { %v1764_v29 = vmax.f32 %v2767_v36, %v2769_v49  ;;  %2444 = vmatpush3.msra.mxu1 %v1808_v10  ;;  %v2389_v49 = vld [vmem:[%s4996_s10] ss:$0 sm:$0xff] }
 0x2ac   :  { %2445 = vmatprep.subr.mxu1 %v1823_v61 }
 0x2ad   :  { %2446 = vmatpush3.msra.mxu1 %v1807_v4  ;;  %v1769_v22 = vmax.f32 %v1763_v34, %v1764_v29  ;;  %v2388_v34 = vld [vmem:[%s4995_s8] ss:$0 sm:$0xff] }
 0x2ae   :  { %2447 = vmatprep.subr.mxu1 %v1822_v0 }
 0x2af   :  { %2448 = vmatpush3.msra.mxu1 %v1806_v3  ;;  %2544 = vmatmul.mubr.f32.vlgmr.msra.gmra.mxu0 %v1769_v22 }
 0x2b0   :  { %2449 = vmatprep.subr.mxu1 %v1821_v24  ;;  %2613 = vmatprep.mubr.msk.f32.mxu0 %vm2773_vm0, %v5028_v8 }
 0x2b1   :  { %2450 = vmatpush3.msra.mxu1 %v1805_v32  ;;  %2582 = vmatpush3.msra.mxu0 %v2176_v17 }
 0x2b2   :  { %2451 = vmatprep.subr.mxu1 %v1820_v39  ;;  %2583 = vmatprep.subr.mxu0 %v5028_v8 }
 0x2b3   :  { %2452 = vmatpush3.msra.mxu1 %v1804_v14  ;;  %2584 = vmatpush3.msra.mxu0 %v2175_v54 }
 0x2b4   :  { %2453 = vmatprep.subr.mxu1 %v1819_v6  ;;  %2585 = vmatprep.subr.mxu0 %v5028_v8 }
 0x2b5   :  { %2454 = vmatpush3.msra.mxu1 %v1803_v12  ;;  %2586 = vmatpush3.msra.mxu0 %v2174_v28 }
 0x2b6   :  { %2455 = vmatprep.subr.mxu1 %v1818_v52  ;;  %2587 = vmatprep.subr.mxu0 %v5028_v8 }
 0x2b7   :  { %2456 = vmatpush3.msra.mxu1 %v1802_v18  ;;  %2588 = vmatpush3.msra.mxu0 %v2173_v57 }
 0x2b8   :  { %1992 = vmatmul.mubr.f32.vlgmr.msra.gmra.mxu1 %v4771_v9  ;;  %2546 = vmatprep.subr.mxu1 %v5028_v8 }
 0x2b9   :  { %2578 = vmatprep.mubr.msk.f32.mxu1 %vm2773_vm0, %v5028_v8  ;;  %2547 = vmatpush3.msra.mxu1 %v2082_v60 }
 0x2ba   :  { %2548 = vmatprep.subr.mxu1 %v5028_v8  ;;  %2589 = vmatprep.subr.mxu0 %v5028_v8 }
 0x2bb   :  { %2549 = vmatpush3.msra.mxu1 %v2081_v59  ;;  %2590 = vmatpush3.msra.mxu0 %v2172_v19 }
 0x2bc   :  { %2550 = vmatprep.subr.mxu1 %v5028_v8  ;;  %2591 = vmatprep.subr.mxu0 %v5028_v8 }
 0x2bd   :  { %2551 = vmatpush3.msra.mxu1 %v2080_v11  ;;  %2592 = vmatpush3.msra.mxu0 %v2171_v21 }
 0x2be   :  { %2552 = vmatprep.subr.mxu1 %v5028_v8  ;;  %2593 = vmatprep.subr.mxu0 %v5028_v8 }
 0x2bf   :  { %2553 = vmatpush3.msra.mxu1 %v2079_v46  ;;  %2594 = vmatpush3.msra.mxu0 %v2170_v58 }
 0x2c0   :  { %2554 = vmatprep.subr.mxu1 %v5028_v8  ;;  %2595 = vmatprep.subr.mxu0 %v5028_v8 }
 0x2c1   :  { %2555 = vmatpush3.msra.mxu1 %v2078_v41  ;;  %2596 = vmatpush3.msra.mxu0 %v2169_v43 }
 0x2c2   :  { %2556 = vmatprep.subr.mxu1 %v5028_v8  ;;  %2597 = vmatprep.subr.mxu0 %v5028_v8 }
 0x2c3   :  { %2557 = vmatpush3.msra.mxu1 %v2077_v55  ;;  %2598 = vmatpush3.msra.mxu0 %v2168_v35 }
 0x2c4   :  { %2558 = vmatprep.subr.mxu1 %v5028_v8  ;;  %2599 = vmatprep.subr.mxu0 %v5028_v8 }
 0x2c5   :  { %2559 = vmatpush3.msra.mxu1 %v2076_v48  ;;  %2600 = vmatpush3.msra.mxu0 %v2167_v27 }
 0x2c6   :  { %2560 = vmatprep.subr.mxu1 %v5028_v8  ;;  %2601 = vmatprep.subr.mxu0 %v5028_v8 }
 0x2c7   :  { %2561 = vmatpush3.msra.mxu1 %v2075_v45  ;;  %2602 = vmatpush3.msra.mxu0 %v2166_v13 }
 0x2c8   :  { %2562 = vmatprep.subr.mxu1 %v5028_v8  ;;  %2603 = vmatprep.subr.mxu0 %v5028_v8 }
 0x2c9   :  { %2563 = vmatpush3.msra.mxu1 %v2074_v30  ;;  %2604 = vmatpush3.msra.mxu0 %v2165_v38 }
 0x2ca   :  { %2564 = vmatprep.subr.mxu1 %v5028_v8  ;;  %2605 = vmatprep.subr.mxu0 %v5028_v8 }
 0x2cb   :  { %2565 = vmatpush3.msra.mxu1 %v2073_v40  ;;  %2606 = vmatpush3.msra.mxu0 %v2164_v7 }
 0x2cc   :  { %2566 = vmatprep.subr.mxu1 %v5028_v8  ;;  %2607 = vmatprep.subr.mxu0 %v5028_v8 }
 0x2cd   :  { %2567 = vmatpush3.msra.mxu1 %v2072_v56  ;;  %2608 = vmatpush3.msra.mxu0 %v2163_v26 }
 0x2ce   :  { %2568 = vmatprep.subr.mxu1 %v5028_v8  ;;  %2609 = vmatprep.subr.mxu0 %v5028_v8 }
 0x2cf   :  { %2569 = vmatpush3.msra.mxu1 %v2071_v2  ;;  %2610 = vmatpush3.msra.mxu0 %v2162_v62 }
 0x2d0   :  { %2570 = vmatprep.subr.mxu1 %v5028_v8  ;;  %2611 = vmatprep.subr.mxu0 %v5028_v8 }
 0x2d1   :  { %2571 = vmatpush3.msra.mxu1 %v2070_v33  ;;  %2612 = vmatpush3.msra.mxu0 %v2161_v50 }
 0x2d2   :  { %2572 = vmatprep.subr.mxu1 %v5028_v8 }
 0x2d3   :  { %2573 = vmatpush3.msra.mxu1 %v2069_v53 }
 0x2d4   :  { %2574 = vmatprep.subr.mxu1 %v5028_v8 }
 0x2d5   :  { %2575 = vmatpush3.msra.mxu1 %v2068_v51 }
 0x2d6   :  { %2576 = vmatprep.subr.mxu1 %v5028_v8 }
 0x2d7   :  { %2577 = vmatpush3.msra.mxu1 %v2067_v44 }
 0x358   :  { %v2422_v31 = vpop.f32.mrf.mxu1 }
 0x35a   :  { %v2423_v9 = vpop.f32.mrf.mxu1 }
 0x35b   :  { %v2424_v20 = vadd.f32 %v2423_v9, %v2422_v31 }
 0x35d   :  { %v1924_v16 = vadd.f32 %v2424_v20, %v2387_v5 }
 0x36f   :  { %v2063_v15 = vpop.f32.mrf.mxu0 }
 0x371   :  { %v2545_v25 = vpop.f32.mrf.mxu0 }
 0x378   :  { %v2457_v63 = vpop.f32.mrf.mxu1 }
 0x37a   :  { %v2458_v37 = vpop.f32.mrf.mxu1 }
 0x37b   :  { %v2459_v23 = vadd.f32 %v2458_v37, %v2457_v63 }
 0x37d   :  { %v1994_v42 = vadd.f32 %v2459_v23, %v1924_v16 }
 0x37f   :  { %v2064_v1 = vadd.f32 %v2063_v15, %v1994_v42 }
 0x381   :  { %2579 = vmatmul.mubr.f32.vlgmr.msra.gmra.mxu1 %v2064_v1 }
 0x441   :  { %v2156_v47 = vpop.f32.mrf.mxu1 }
 0x442   :  { %v2157_v10 = vadd.f32 %v2388_v34, %v2156_v47 }
 0x443   :  { %v2580_v36 = vpop.f32.mrf.mxu1 }
 0x444   :  { %2770 = vtanh.f32 %v2157_v10 }
 0x451   :  { %v2771_v61 = vpop.eup %2770 }
 0x452   :  { %2614 = vmatmul.mubr.f32.vlgmr.msra.gmra.mxu0 %v2771_v61 }
 0x512   :  { %v2250_v4 = vpop.f32.mrf.mxu0 }
 0x513   :  { %v2251_v29 = vadd.f32 %v2389_v49, %v2250_v4 }
 0x514   :  { %v2615_v0 = vpop.f32.mrf.mxu0 }
 0x515   :  { %2254 = vst [vmem:[%s4997_s11] sm:$0xff] %v2251_v29 }

</bundles_post_ra>
